<compile_context>
chip_gen: v7x
topology: tpu7x:2x2x1
jax: 0.10.0
libtpu: 0.0.40
codegen_flags: <defaults>
</compile_context>

<pallas_src>
import numpy as np
import jax
import jax.numpy as jnp
from jax.experimental import pallas as pl
from jax.experimental.pallas import tpu as pltpu


# ----------------------------- hyperparameters ------------------------------
N_BATCH = 2
SEQ_LEN = 16                         # L
NUM_INPUT_CHANNELS = 4               # conf 'num_input_channels'
NUM_LATENT_CHANNELS = 32             # conf 'num_latent_channels'
NUM_INCEPTION_BLOCKS = 2             # conf 'num_inception_blocks'
BOTTLENECK_CHANNELS = 8              # conf 'inception_bottleneck_channels'
INCEPTION_KERNEL_SIZES = [1, 3, 5]   # conf 'inception_kernel_sizes' (sorted, first == 1)
C_PAD = 128                          # lane-dense channel padding


# ------------------------------ Pallas kernel -------------------------------
def make_net_kernel(num_blocks, n_batch, seq_len, c_pad, shifts):
    """Kernel for the full _InceptionNet on a (N*L, C_PAD) slab kept in VMEM."""
    nl = n_batch * seq_len

    def kernel(x_ref, w_ref, gamma_ref, beta_ref, o_ref):
        # position l of each row within its sample (rows are (n, l) row-major)
        row = jax.lax.broadcasted_iota(jnp.int32, (nl, c_pad), 0)
        pos = row % seq_len

        x = x_ref[...]                                      # (NL, C_PAD) f32
        for blk in range(num_blocks):                       # static unrolled loop
            # cyclic rolled copies of x along the flattened row axis
            # rolled[d][p] == x[p + d]  (cyclic; masked per use below)
            rolled = {}
            for d in shifts:
                rolled[d] = x if d == 0 else pltpu.roll(x, (-d) % nl, 0)

            # identity link: MaxPool1d(3, stride=1, padding=1, -inf pad).
            # At sample edges the missing neighbour is replaced by the centre
            # value, which leaves the window max unchanged.
            up = jnp.where(pos == 0, x, rolled[-1])          # x[p-1]
            dn = jnp.where(pos == seq_len - 1, x, rolled[1]) # x[p+1]
            pooled = jnp.maximum(jnp.maximum(up, x), dn)

            # conv taps: zero outside the sample (Conv1d zero padding); the
            # bottleneck is folded into the weights, so taps are taken on x.
            segs = [pooled]
            for d in shifts:
                if d == 0:
                    segs.append(x)
                else:
                    valid = (pos + d >= 0) & (pos + d < seq_len)
                    segs.append(jnp.where(valid, rolled[d], 0.0))

            # one matmul per block: identity link + all branches + concat
            lhs = jnp.concatenate(segs, axis=-1)             # (NL, num_seg*C_PAD)
            y = jnp.dot(lhs, w_ref[blk],                     # (NL, C_PAD)
                        preferred_element_type=jnp.float32)
            # Conv1d bias omitted: it cancels exactly in the training-mode
            # BatchNorm mean subtraction below.

            # BatchNorm1d (training-mode batch stats over N*L) + ReLU
            mean = jnp.mean(y, axis=0, keepdims=True)
            var = jnp.mean((y - mean) ** 2, axis=0, keepdims=True)
            yhat = (y - mean) * jax.lax.rsqrt(var + 1e-5)
            x = jnp.maximum(gamma_ref[blk] * yhat + beta_ref[blk], 0.0)

        o_ref[...] = x                                       # lane-dense (NL, 128)

    return kernel


def inception_net_pallas(x_ncl, fused):
    """Full _InceptionNet forward. Input/output in PyTorch NCL convention."""
    n, c_in, seq = x_ncl.shape
    c_pad, shifts = fused["c_pad"], fused["shifts"]
    num_blocks = fused["w_all"].shape[0]
    out_ch = fused["out_ch"]
    nl = n * seq

    x2d = jnp.transpose(x_ncl, (0, 2, 1)).reshape(nl, c_in)          # (NL, Cin)
    x2d = jnp.pad(x2d, ((0, 0), (0, c_pad - c_in)))                  # (NL, C_PAD)

    kernel = make_net_kernel(num_blocks, n, seq, c_pad, shifts)
    vmem = pl.BlockSpec(memory_space=pltpu.MemorySpace.VMEM)
    out = pl.pallas_call(
        kernel,
        out_shape=jax.ShapeDtypeStruct((nl, c_pad), jnp.float32),
        in_specs=[vmem, vmem, vmem, vmem],
        out_specs=vmem,
    )(x2d, fused["w_all"], fused["gamma_all"], fused["beta_all"])

    out = out[:, :out_ch].reshape(n, seq, out_ch)
    return jnp.transpose(out, (0, 2, 1))                             # back to NCL


# ------------------------ parameter initialization --------------------------
def init_block_params(key, in_ch, out_ch, bottleneck_ch, ksizes):
    ksizes = sorted(int(k) for k in ksizes)
    assert ksizes[0] == 1
    num_layers = len(ksizes)
    layer_ch = [out_ch // num_layers] * num_layers
    for i in range(out_ch % num_layers):
        layer_ch[i] += 1
    assert sum(layer_ch) == out_ch

    keys = jax.random.split(key, 2 + 2 * (num_layers - 1))
    scale = 0.1
    w_id = jax.random.normal(keys[0], (in_ch, layer_ch[0]), jnp.float32) * scale
    w_bn = jax.random.normal(keys[1], (in_ch, bottleneck_ch), jnp.float32) * scale
    conv = []
    ki = 2
    for ks, ch in zip(ksizes[1:], layer_ch[1:]):
        w = jax.random.normal(keys[ki], (ks, bottleneck_ch, ch), jnp.float32) * scale
        b = jax.random.normal(keys[ki + 1], (ch,), jnp.float32) * scale
        conv.append((ks, w, b))
        ki += 2
    return {"in_ch": in_ch, "out_ch": out_ch, "layer_ch": layer_ch,
            "w_id": w_id, "w_bn": w_bn, "conv": conv,
            "gamma": jnp.ones((out_ch,), jnp.float32),     # BatchNorm1d defaults
            "beta": jnp.zeros((out_ch,), jnp.float32)}


def build_fused_params(block_params, c_pad, shifts):
    """Fold bottleneck into branch weights, zero-embed segments, stack per block."""
    num_blocks = len(block_params)
    num_seg = 1 + len(shifts)                       # pooled + one per shift
    w_all = np.zeros((num_blocks, num_seg * c_pad, c_pad), np.float32)
    gamma_all = np.ones((num_blocks, 1, c_pad), np.float32)
    beta_all = np.zeros((num_blocks, 1, c_pad), np.float32)

    for bi, p in enumerate(block_params):
        in_ch, out_ch, layer_ch = p["in_ch"], p["out_ch"], p["layer_ch"]
        offsets = np.cumsum([0] + layer_ch)
        # segment 0 (pooled) -> identity-link 1x1 conv, channel range of layer 0
        w_all[bi, 0:in_ch, offsets[0]:offsets[1]] = np.asarray(p["w_id"])
        # branch convs folded with the bottleneck: tap(x) @ (w_bn @ w_conv[k])
        w_bn = np.asarray(p["w_bn"])
        for li, (ks, w_conv, _bias) in enumerate(p["conv"]):
            half = ks // 2
            lo, hi = int(offsets[li + 1]), int(offsets[li + 2])
            w_conv = np.asarray(w_conv)
            for d in shifts:
                if abs(d) > half:
                    continue
                si = 1 + shifts.index(d)
                w_all[bi, si * c_pad: si * c_pad + in_ch, lo:hi] += w_bn @ w_conv[half + d]
        gamma_all[bi, 0, :out_ch] = np.asarray(p["gamma"])
        beta_all[bi, 0, :out_ch] = np.asarray(p["beta"])

    return {"w_all": jnp.asarray(w_all),
            "gamma_all": jnp.asarray(gamma_all),
            "beta_all": jnp.asarray(beta_all),
            "c_pad": c_pad, "shifts": shifts,
            "out_ch": block_params[-1]["out_ch"]}


# --------------------------- pure-JAX reference ------------------------------
def ref_block(x_nlc, p):
    n, seq, _ = x_nlc.shape
    neg = jnp.full((n, 1, x_nlc.shape[2]), -jnp.inf, x_nlc.dtype)
    xp = jnp.concatenate([neg, x_nlc, neg], axis=1)
    pooled = jnp.maximum(jnp.maximum(xp[:, :seq], xp[:, 1:seq + 1]), xp[:, 2:seq + 2])
    outs = [jnp.einsum("nlc,co->nlo", pooled, p["w_id"])]
    b = jnp.einsum("nlc,co->nlo", x_nlc, p["w_bn"])
    for ks, w, bias in p["conv"]:
        half = ks // 2
        bp = jnp.pad(b, ((0, 0), (half, half), (0, 0)))
        acc = sum(jnp.einsum("nlc,co->nlo", bp[:, k:k + seq], w[k]) for k in range(ks))
        outs.append(acc + bias)                      # bias kept here (cancels in BN)
    y = jnp.concatenate(outs, axis=-1)
    mean = y.mean(axis=(0, 1), keepdims=True)
    var = ((y - mean) ** 2).mean(axis=(0, 1), keepdims=True)
    yhat = (y - mean) / jnp.sqrt(var + 1e-5)
    return jnp.maximum(p["gamma"] * yhat + p["beta"], 0.0)


def ref_net(x_ncl, block_params):
    x = jnp.transpose(x_ncl, (0, 2, 1))
    for p in block_params:
        x = ref_block(x, p)
    return jnp.transpose(x, (0, 2, 1))


# ----------------------------------- main ------------------------------------
if __name__ == "__main__":
    key = jax.random.PRNGKey(0)
    kx, *bkeys = jax.random.split(key, 1 + NUM_INCEPTION_BLOCKS)

    x = jax.random.normal(kx, (N_BATCH, NUM_INPUT_CHANNELS, SEQ_LEN), jnp.float32)

    blocks = []
    in_ch = NUM_INPUT_CHANNELS
    for d in range(NUM_INCEPTION_BLOCKS):
        blocks.append(init_block_params(bkeys[d], in_ch, NUM_LATENT_CHANNELS,
                                        BOTTLENECK_CHANNELS, INCEPTION_KERNEL_SIZES))
        in_ch = NUM_LATENT_CHANNELS

    max_half = max(int(k) // 2 for k in INCEPTION_KERNEL_SIZES)
    shifts = sorted(set(range(-max_half, max_half + 1)) | {-1, 0, 1})
    fused = build_fused_params(blocks, C_PAD, shifts)

    out = jax.block_until_ready(inception_net_pallas(x, fused))
    assert out.shape == (N_BATCH, NUM_LATENT_CHANNELS, SEQ_LEN)
    assert out.dtype == jnp.float32

    ref = jax.block_until_ready(ref_net(x, blocks))
    np.testing.assert_allclose(np.asarray(out), np.asarray(ref), rtol=2e-2, atol=2e-2)

    print("KERNEL_OK")
</pallas_src>

<mosaic_0001>
module attributes {stable_mosaic.version = 11 : i64} {
  func.func @kernel(%arg0: memref<32x128xf32, #tpu.memory_space<vmem>>, %arg1: memref<2x768x128xf32, #tpu.memory_space<vmem>>, %arg2: memref<2x1x128xf32, #tpu.memory_space<vmem>>, %arg3: memref<2x1x128xf32, #tpu.memory_space<vmem>>, %arg4: memref<32x128xf32, #tpu.memory_space<vmem>>) attributes {dimension_semantics = [], scalar_prefetch = 0 : i64, scratch_operands = 0 : i64, tpu.core_type = #tpu.core_type<tc>} {
    %0 = tpu.iota {dimensions = array<i32: 0>} : vector<32x128xi32>
    %c16_i32 = arith.constant 16 : i32
    %c0_i32 = arith.constant 0 : i32
    %1 = arith.cmpi eq, %c16_i32, %c0_i32 : i32
    %c1_i32 = arith.constant 1 : i32
    %2 = arith.select %1, %c1_i32, %c16_i32 : i32
    %3 = vector.broadcast %2 : i32 to vector<32x128xi32>
    %4 = arith.remsi %0, %3 : vector<32x128xi32>
    %c0_i32_0 = arith.constant 0 : i32
    %5 = vector.broadcast %c0_i32_0 : i32 to vector<32x128xi32>
    %6 = arith.cmpi ne, %4, %5 : vector<32x128xi32>
    %c0_i32_1 = arith.constant 0 : i32
    %7 = vector.broadcast %c0_i32_1 : i32 to vector<32x128xi32>
    %8 = arith.cmpi slt, %4, %7 : vector<32x128xi32>
    %c0_i32_2 = arith.constant 0 : i32
    %9 = arith.cmpi slt, %2, %c0_i32_2 : i32
    %10 = vector.broadcast %9 : i1 to vector<32x128xi1>
    %11 = vector.broadcast %10 : vector<32x128xi1> to vector<32x128xi1>
    %12 = arith.xori %8, %11 : vector<32x128xi1>
    %13 = arith.andi %12, %6 : vector<32x128xi1>
    %14 = vector.broadcast %2 : i32 to vector<32x128xi32>
    %15 = arith.addi %4, %14 : vector<32x128xi32>
    %16 = arith.select %13, %15, %4 : vector<32x128xi1>, vector<32x128xi32>
    %c0 = arith.constant 0 : index
    %c0_3 = arith.constant 0 : index
    %17 = vector.load %arg0[%c0, %c0_3] : memref<32x128xf32, #tpu.memory_space<vmem>>, vector<32x128xf32>
    %c2_i32 = arith.constant 2 : i32
    %18 = tpu.dynamic_rotate %17 by %c2_i32 dim 0 : vector<32x128xf32>, i32 -> vector<32x128xf32>
    %c1_i32_4 = arith.constant 1 : i32
    %19 = tpu.dynamic_rotate %17 by %c1_i32_4 dim 0 : vector<32x128xf32>, i32 -> vector<32x128xf32>
    %c31_i32 = arith.constant 31 : i32
    %20 = tpu.dynamic_rotate %17 by %c31_i32 dim 0 : vector<32x128xf32>, i32 -> vector<32x128xf32>
    %c30_i32 = arith.constant 30 : i32
    %21 = tpu.dynamic_rotate %17 by %c30_i32 dim 0 : vector<32x128xf32>, i32 -> vector<32x128xf32>
    %c0_i32_5 = arith.constant 0 : i32
    %22 = vector.broadcast %c0_i32_5 : i32 to vector<32x128xi32>
    %23 = arith.cmpi eq, %16, %22 : vector<32x128xi32>
    %24 = arith.select %23, %17, %19 : vector<32x128xi1>, vector<32x128xf32>
    %c15_i32 = arith.constant 15 : i32
    %25 = vector.broadcast %c15_i32 : i32 to vector<32x128xi32>
    %26 = arith.cmpi eq, %16, %25 : vector<32x128xi32>
    %27 = arith.select %26, %17, %20 : vector<32x128xi1>, vector<32x128xf32>
    %28 = arith.maximumf %24, %17 : vector<32x128xf32>
    %29 = arith.maximumf %28, %27 : vector<32x128xf32>
    %c-2_i32 = arith.constant -2 : i32
    %30 = vector.broadcast %c-2_i32 : i32 to vector<32x128xi32>
    %31 = arith.addi %16, %30 : vector<32x128xi32>
    %c0_i32_6 = arith.constant 0 : i32
    %32 = vector.broadcast %c0_i32_6 : i32 to vector<32x128xi32>
    %33 = arith.cmpi sge, %31, %32 : vector<32x128xi32>
    %c-2_i32_7 = arith.constant -2 : i32
    %34 = vector.broadcast %c-2_i32_7 : i32 to vector<32x128xi32>
    %35 = arith.addi %16, %34 : vector<32x128xi32>
    %c16_i32_8 = arith.constant 16 : i32
    %36 = vector.broadcast %c16_i32_8 : i32 to vector<32x128xi32>
    %37 = arith.cmpi slt, %35, %36 : vector<32x128xi32>
    %38 = arith.andi %33, %37 : vector<32x128xi1>
    %cst = arith.constant 0.000000e+00 : f32
    %39 = vector.broadcast %cst : f32 to vector<32x128xf32>
    %40 = arith.select %38, %18, %39 : vector<32x128xi1>, vector<32x128xf32>
    %c-1_i32 = arith.constant -1 : i32
    %41 = vector.broadcast %c-1_i32 : i32 to vector<32x128xi32>
    %42 = arith.addi %16, %41 : vector<32x128xi32>
    %c0_i32_9 = arith.constant 0 : i32
    %43 = vector.broadcast %c0_i32_9 : i32 to vector<32x128xi32>
    %44 = arith.cmpi sge, %42, %43 : vector<32x128xi32>
    %c-1_i32_10 = arith.constant -1 : i32
    %45 = vector.broadcast %c-1_i32_10 : i32 to vector<32x128xi32>
    %46 = arith.addi %16, %45 : vector<32x128xi32>
    %c16_i32_11 = arith.constant 16 : i32
    %47 = vector.broadcast %c16_i32_11 : i32 to vector<32x128xi32>
    %48 = arith.cmpi slt, %46, %47 : vector<32x128xi32>
    %49 = arith.andi %44, %48 : vector<32x128xi1>
    %cst_12 = arith.constant 0.000000e+00 : f32
    %50 = vector.broadcast %cst_12 : f32 to vector<32x128xf32>
    %51 = arith.select %49, %19, %50 : vector<32x128xi1>, vector<32x128xf32>
    %c1_i32_13 = arith.constant 1 : i32
    %52 = vector.broadcast %c1_i32_13 : i32 to vector<32x128xi32>
    %53 = arith.addi %16, %52 : vector<32x128xi32>
    %c0_i32_14 = arith.constant 0 : i32
    %54 = vector.broadcast %c0_i32_14 : i32 to vector<32x128xi32>
    %55 = arith.cmpi sge, %53, %54 : vector<32x128xi32>
    %c1_i32_15 = arith.constant 1 : i32
    %56 = vector.broadcast %c1_i32_15 : i32 to vector<32x128xi32>
    %57 = arith.addi %16, %56 : vector<32x128xi32>
    %c16_i32_16 = arith.constant 16 : i32
    %58 = vector.broadcast %c16_i32_16 : i32 to vector<32x128xi32>
    %59 = arith.cmpi slt, %57, %58 : vector<32x128xi32>
    %60 = arith.andi %55, %59 : vector<32x128xi1>
    %cst_17 = arith.constant 0.000000e+00 : f32
    %61 = vector.broadcast %cst_17 : f32 to vector<32x128xf32>
    %62 = arith.select %60, %20, %61 : vector<32x128xi1>, vector<32x128xf32>
    %c2_i32_18 = arith.constant 2 : i32
    %63 = vector.broadcast %c2_i32_18 : i32 to vector<32x128xi32>
    %64 = arith.addi %16, %63 : vector<32x128xi32>
    %c0_i32_19 = arith.constant 0 : i32
    %65 = vector.broadcast %c0_i32_19 : i32 to vector<32x128xi32>
    %66 = arith.cmpi sge, %64, %65 : vector<32x128xi32>
    %c2_i32_20 = arith.constant 2 : i32
    %67 = vector.broadcast %c2_i32_20 : i32 to vector<32x128xi32>
    %68 = arith.addi %16, %67 : vector<32x128xi32>
    %c16_i32_21 = arith.constant 16 : i32
    %69 = vector.broadcast %c16_i32_21 : i32 to vector<32x128xi32>
    %70 = arith.cmpi slt, %68, %69 : vector<32x128xi32>
    %71 = arith.andi %66, %70 : vector<32x128xi1>
    %cst_22 = arith.constant 0.000000e+00 : f32
    %72 = vector.broadcast %cst_22 : f32 to vector<32x128xf32>
    %73 = arith.select %71, %21, %72 : vector<32x128xi1>, vector<32x128xf32>
    %74 = tpu.concatenate %29, %40, %51, %17, %62, %73 in 1 : vector<32x128xf32>, vector<32x128xf32>, vector<32x128xf32>, vector<32x128xf32>, vector<32x128xf32>, vector<32x128xf32> -> vector<32x768xf32>
    %c0_23 = arith.constant 0 : index
    %c0_24 = arith.constant 0 : index
    %c0_25 = arith.constant 0 : index
    %75 = vector.load %arg1[%c0_23, %c0_24, %c0_25] : memref<2x768x128xf32, #tpu.memory_space<vmem>>, vector<1x768x128xf32>
    %76 = vector.shape_cast %75 : vector<1x768x128xf32> to vector<768x128xf32>
    %cst_26 = arith.constant dense<0.000000e+00> : vector<32x128xf32>
    %77 = tpu.matmul %74, %76, %cst_26 {dimension_numbers = #tpu.dot_dimension_numbers<[1], [0], [0], [1], [0, 0, 1, 1], [], []>} : vector<32x768xf32>, vector<768x128xf32>, vector<32x128xf32> -> vector<32x128xf32>
    %cst_27 = arith.constant dense<0.000000e+00> : vector<128xf32>
    %78 = vector.multi_reduction <add>, %77, %cst_27 [0] : vector<32x128xf32> to vector<128xf32>
    %79 = vector.shape_cast %78 : vector<128xf32> to vector<1x128xf32>
    %cst_28 = arith.constant 3.200000e+01 : f32
    %80 = vector.broadcast %cst_28 : f32 to vector<1x128xf32>
    %81 = arith.divf %79, %80 : vector<1x128xf32>
    %82 = vector.broadcast %81 : vector<1x128xf32> to vector<32x128xf32>
    %83 = arith.subf %77, %82 : vector<32x128xf32>
    %84 = arith.mulf %83, %83 : vector<32x128xf32>
    %cst_29 = arith.constant dense<0.000000e+00> : vector<128xf32>
    %85 = vector.multi_reduction <add>, %84, %cst_29 [0] : vector<32x128xf32> to vector<128xf32>
    %86 = vector.shape_cast %85 : vector<128xf32> to vector<1x128xf32>
    %cst_30 = arith.constant 3.200000e+01 : f32
    %87 = vector.broadcast %cst_30 : f32 to vector<1x128xf32>
    %88 = arith.divf %86, %87 : vector<1x128xf32>
    %89 = vector.broadcast %81 : vector<1x128xf32> to vector<32x128xf32>
    %90 = arith.subf %77, %89 : vector<32x128xf32>
    %cst_31 = arith.constant 9.99999974E-6 : f32
    %91 = vector.broadcast %cst_31 : f32 to vector<1x128xf32>
    %92 = arith.addf %88, %91 : vector<1x128xf32>
    %93 = math.rsqrt %92 : vector<1x128xf32>
    %94 = vector.broadcast %93 : vector<1x128xf32> to vector<32x128xf32>
    %95 = arith.mulf %90, %94 : vector<32x128xf32>
    %c0_32 = arith.constant 0 : index
    %c0_33 = arith.constant 0 : index
    %c0_34 = arith.constant 0 : index
    %96 = vector.load %arg2[%c0_32, %c0_33, %c0_34] : memref<2x1x128xf32, #tpu.memory_space<vmem>>, vector<1x1x128xf32>
    %97 = vector.shape_cast %96 : vector<1x1x128xf32> to vector<1x128xf32>
    %98 = vector.broadcast %97 : vector<1x128xf32> to vector<32x128xf32>
    %99 = arith.mulf %98, %95 : vector<32x128xf32>
    %c0_35 = arith.constant 0 : index
    %c0_36 = arith.constant 0 : index
    %c0_37 = arith.constant 0 : index
    %100 = vector.load %arg3[%c0_35, %c0_36, %c0_37] : memref<2x1x128xf32, #tpu.memory_space<vmem>>, vector<1x1x128xf32>
    %101 = vector.shape_cast %100 : vector<1x1x128xf32> to vector<1x128xf32>
    %102 = vector.broadcast %101 : vector<1x128xf32> to vector<32x128xf32>
    %103 = arith.addf %99, %102 : vector<32x128xf32>
    %cst_38 = arith.constant 0.000000e+00 : f32
    %104 = vector.broadcast %cst_38 : f32 to vector<32x128xf32>
    %105 = arith.maximumf %103, %104 : vector<32x128xf32>
    %c2_i32_39 = arith.constant 2 : i32
    %106 = tpu.dynamic_rotate %105 by %c2_i32_39 dim 0 : vector<32x128xf32>, i32 -> vector<32x128xf32>
    %c1_i32_40 = arith.constant 1 : i32
    %107 = tpu.dynamic_rotate %105 by %c1_i32_40 dim 0 : vector<32x128xf32>, i32 -> vector<32x128xf32>
    %c31_i32_41 = arith.constant 31 : i32
    %108 = tpu.dynamic_rotate %105 by %c31_i32_41 dim 0 : vector<32x128xf32>, i32 -> vector<32x128xf32>
    %c30_i32_42 = arith.constant 30 : i32
    %109 = tpu.dynamic_rotate %105 by %c30_i32_42 dim 0 : vector<32x128xf32>, i32 -> vector<32x128xf32>
    %c0_i32_43 = arith.constant 0 : i32
    %110 = vector.broadcast %c0_i32_43 : i32 to vector<32x128xi32>
    %111 = arith.cmpi eq, %16, %110 : vector<32x128xi32>
    %112 = arith.select %111, %105, %107 : vector<32x128xi1>, vector<32x128xf32>
    %c15_i32_44 = arith.constant 15 : i32
    %113 = vector.broadcast %c15_i32_44 : i32 to vector<32x128xi32>
    %114 = arith.cmpi eq, %16, %113 : vector<32x128xi32>
    %115 = arith.select %114, %105, %108 : vector<32x128xi1>, vector<32x128xf32>
    %116 = arith.maximumf %112, %105 : vector<32x128xf32>
    %117 = arith.maximumf %116, %115 : vector<32x128xf32>
    %c-2_i32_45 = arith.constant -2 : i32
    %118 = vector.broadcast %c-2_i32_45 : i32 to vector<32x128xi32>
    %119 = arith.addi %16, %118 : vector<32x128xi32>
    %c0_i32_46 = arith.constant 0 : i32
    %120 = vector.broadcast %c0_i32_46 : i32 to vector<32x128xi32>
    %121 = arith.cmpi sge, %119, %120 : vector<32x128xi32>
    %c-2_i32_47 = arith.constant -2 : i32
    %122 = vector.broadcast %c-2_i32_47 : i32 to vector<32x128xi32>
    %123 = arith.addi %16, %122 : vector<32x128xi32>
    %c16_i32_48 = arith.constant 16 : i32
    %124 = vector.broadcast %c16_i32_48 : i32 to vector<32x128xi32>
    %125 = arith.cmpi slt, %123, %124 : vector<32x128xi32>
    %126 = arith.andi %121, %125 : vector<32x128xi1>
    %cst_49 = arith.constant 0.000000e+00 : f32
    %127 = vector.broadcast %cst_49 : f32 to vector<32x128xf32>
    %128 = arith.select %126, %106, %127 : vector<32x128xi1>, vector<32x128xf32>
    %c-1_i32_50 = arith.constant -1 : i32
    %129 = vector.broadcast %c-1_i32_50 : i32 to vector<32x128xi32>
    %130 = arith.addi %16, %129 : vector<32x128xi32>
    %c0_i32_51 = arith.constant 0 : i32
    %131 = vector.broadcast %c0_i32_51 : i32 to vector<32x128xi32>
    %132 = arith.cmpi sge, %130, %131 : vector<32x128xi32>
    %c-1_i32_52 = arith.constant -1 : i32
    %133 = vector.broadcast %c-1_i32_52 : i32 to vector<32x128xi32>
    %134 = arith.addi %16, %133 : vector<32x128xi32>
    %c16_i32_53 = arith.constant 16 : i32
    %135 = vector.broadcast %c16_i32_53 : i32 to vector<32x128xi32>
    %136 = arith.cmpi slt, %134, %135 : vector<32x128xi32>
    %137 = arith.andi %132, %136 : vector<32x128xi1>
    %cst_54 = arith.constant 0.000000e+00 : f32
    %138 = vector.broadcast %cst_54 : f32 to vector<32x128xf32>
    %139 = arith.select %137, %107, %138 : vector<32x128xi1>, vector<32x128xf32>
    %c1_i32_55 = arith.constant 1 : i32
    %140 = vector.broadcast %c1_i32_55 : i32 to vector<32x128xi32>
    %141 = arith.addi %16, %140 : vector<32x128xi32>
    %c0_i32_56 = arith.constant 0 : i32
    %142 = vector.broadcast %c0_i32_56 : i32 to vector<32x128xi32>
    %143 = arith.cmpi sge, %141, %142 : vector<32x128xi32>
    %c1_i32_57 = arith.constant 1 : i32
    %144 = vector.broadcast %c1_i32_57 : i32 to vector<32x128xi32>
    %145 = arith.addi %16, %144 : vector<32x128xi32>
    %c16_i32_58 = arith.constant 16 : i32
    %146 = vector.broadcast %c16_i32_58 : i32 to vector<32x128xi32>
    %147 = arith.cmpi slt, %145, %146 : vector<32x128xi32>
    %148 = arith.andi %143, %147 : vector<32x128xi1>
    %cst_59 = arith.constant 0.000000e+00 : f32
    %149 = vector.broadcast %cst_59 : f32 to vector<32x128xf32>
    %150 = arith.select %148, %108, %149 : vector<32x128xi1>, vector<32x128xf32>
    %c2_i32_60 = arith.constant 2 : i32
    %151 = vector.broadcast %c2_i32_60 : i32 to vector<32x128xi32>
    %152 = arith.addi %16, %151 : vector<32x128xi32>
    %c0_i32_61 = arith.constant 0 : i32
    %153 = vector.broadcast %c0_i32_61 : i32 to vector<32x128xi32>
    %154 = arith.cmpi sge, %152, %153 : vector<32x128xi32>
    %c2_i32_62 = arith.constant 2 : i32
    %155 = vector.broadcast %c2_i32_62 : i32 to vector<32x128xi32>
    %156 = arith.addi %16, %155 : vector<32x128xi32>
    %c16_i32_63 = arith.constant 16 : i32
    %157 = vector.broadcast %c16_i32_63 : i32 to vector<32x128xi32>
    %158 = arith.cmpi slt, %156, %157 : vector<32x128xi32>
    %159 = arith.andi %154, %158 : vector<32x128xi1>
    %cst_64 = arith.constant 0.000000e+00 : f32
    %160 = vector.broadcast %cst_64 : f32 to vector<32x128xf32>
    %161 = arith.select %159, %109, %160 : vector<32x128xi1>, vector<32x128xf32>
    %162 = tpu.concatenate %117, %128, %139, %105, %150, %161 in 1 : vector<32x128xf32>, vector<32x128xf32>, vector<32x128xf32>, vector<32x128xf32>, vector<32x128xf32>, vector<32x128xf32> -> vector<32x768xf32>
    %c1 = arith.constant 1 : index
    %c0_65 = arith.constant 0 : index
    %c0_66 = arith.constant 0 : index
    %163 = vector.load %arg1[%c1, %c0_65, %c0_66] : memref<2x768x128xf32, #tpu.memory_space<vmem>>, vector<1x768x128xf32>
    %164 = vector.shape_cast %163 : vector<1x768x128xf32> to vector<768x128xf32>
    %cst_67 = arith.constant dense<0.000000e+00> : vector<32x128xf32>
    %165 = tpu.matmul %162, %164, %cst_67 {dimension_numbers = #tpu.dot_dimension_numbers<[1], [0], [0], [1], [0, 0, 1, 1], [], []>} : vector<32x768xf32>, vector<768x128xf32>, vector<32x128xf32> -> vector<32x128xf32>
    %cst_68 = arith.constant dense<0.000000e+00> : vector<128xf32>
    %166 = vector.multi_reduction <add>, %165, %cst_68 [0] : vector<32x128xf32> to vector<128xf32>
    %167 = vector.shape_cast %166 : vector<128xf32> to vector<1x128xf32>
    %cst_69 = arith.constant 3.200000e+01 : f32
    %168 = vector.broadcast %cst_69 : f32 to vector<1x128xf32>
    %169 = arith.divf %167, %168 : vector<1x128xf32>
    %170 = vector.broadcast %169 : vector<1x128xf32> to vector<32x128xf32>
    %171 = arith.subf %165, %170 : vector<32x128xf32>
    %172 = arith.mulf %171, %171 : vector<32x128xf32>
    %cst_70 = arith.constant dense<0.000000e+00> : vector<128xf32>
    %173 = vector.multi_reduction <add>, %172, %cst_70 [0] : vector<32x128xf32> to vector<128xf32>
    %174 = vector.shape_cast %173 : vector<128xf32> to vector<1x128xf32>
    %cst_71 = arith.constant 3.200000e+01 : f32
    %175 = vector.broadcast %cst_71 : f32 to vector<1x128xf32>
    %176 = arith.divf %174, %175 : vector<1x128xf32>
    %177 = vector.broadcast %169 : vector<1x128xf32> to vector<32x128xf32>
    %178 = arith.subf %165, %177 : vector<32x128xf32>
    %cst_72 = arith.constant 9.99999974E-6 : f32
    %179 = vector.broadcast %cst_72 : f32 to vector<1x128xf32>
    %180 = arith.addf %176, %179 : vector<1x128xf32>
    %181 = math.rsqrt %180 : vector<1x128xf32>
    %182 = vector.broadcast %181 : vector<1x128xf32> to vector<32x128xf32>
    %183 = arith.mulf %178, %182 : vector<32x128xf32>
    %c1_73 = arith.constant 1 : index
    %c0_74 = arith.constant 0 : index
    %c0_75 = arith.constant 0 : index
    %184 = vector.load %arg2[%c1_73, %c0_74, %c0_75] : memref<2x1x128xf32, #tpu.memory_space<vmem>>, vector<1x1x128xf32>
    %185 = vector.shape_cast %184 : vector<1x1x128xf32> to vector<1x128xf32>
    %186 = vector.broadcast %185 : vector<1x128xf32> to vector<32x128xf32>
    %187 = arith.mulf %186, %183 : vector<32x128xf32>
    %c1_76 = arith.constant 1 : index
    %c0_77 = arith.constant 0 : index
    %c0_78 = arith.constant 0 : index
    %188 = vector.load %arg3[%c1_76, %c0_77, %c0_78] : memref<2x1x128xf32, #tpu.memory_space<vmem>>, vector<1x1x128xf32>
    %189 = vector.shape_cast %188 : vector<1x1x128xf32> to vector<1x128xf32>
    %190 = vector.broadcast %189 : vector<1x128xf32> to vector<32x128xf32>
    %191 = arith.addf %187, %190 : vector<32x128xf32>
    %cst_79 = arith.constant 0.000000e+00 : f32
    %192 = vector.broadcast %cst_79 : f32 to vector<32x128xf32>
    %193 = arith.maximumf %191, %192 : vector<32x128xf32>
    %c0_80 = arith.constant 0 : index
    %c0_81 = arith.constant 0 : index
    %194 = vector.load %arg4[%c0_80, %c0_81] : memref<32x128xf32, #tpu.memory_space<vmem>>, vector<32x128xf32>
    tpu.vector_store %arg4[%c0_80, %c0_81], %193 {strides = array<i32>} : memref<32x128xf32, #tpu.memory_space<vmem>>, vector<32x128xf32>,
    return
  }
}

</mosaic_0001>

<bundles_post_ra>
// kernel: tpu_custom_call.1
= control target key start
LH: loop header
LB: loop body
LE: loop exit
PB: predicated region body
PF: predicated region fallthrough
CT: control target
= control target key end

     0   :  { %9 = vsyncpa [#allocation3], 0  ;;  %s2091_s0 = inlined_call_operand.hbm [shape: f32[32,128], index: 0, kind: input, shape index: {}]   ;;  %s2092_s1 = inlined_call_operand.hbm [shape: f32[2,768,128], index: 1, kind: input, shape index: {}]   ;;  %s2093_s2 = inlined_call_operand.vmem [shape: f32[2,1,128], index: 2, kind: input, shape index: {}]   ;;  %s2094_s3 = inlined_call_operand.vmem [shape: f32[2,1,128], index: 3, kind: input, shape index: {}]   ;;  %s2095_s4 = inlined_call_operand.hbm [shape: f32[32,128], index: 4, kind: output, shape index: {}]  }
   0x1   :  { %10 = vsyncpa [#allocation6], 0 }
   0x2   :  { %11 = vsyncpa [#allocation4], 0  ;;  %s1714_s15 = smov [#allocation2]   ;;  %s1642_s19 = scalar_lea.hbm %s2091_s0, 512 }
   0x3   :  { %s17_s16 = sshll.u32 %s1714_s15, 4  ;;  %p1643_p0 = scmp.ne.s32.totalorder %s2091_s0, %s1642_s19  ;;  %s18_s16 = int_to_ptr.vmem [resolvable:$true] %s17_s16 }
   0x4   :  { %p1646_p1 = scmp.lt.u32.totalorder %s1642_s19, %s2091_s0 }
   0x6   :  { %p1648_p2 = pnand %p1646_p1, %p1643_p0 }
   0x8   :  { %1651 = shalt.err (!%p1648_p2)
}
   0x9   :  { %s1652_s24 = scalar_lea.vmem %s18_s16, 512  ;;  %p1657_p4 = scmp.lt.s32.totalorder %s18_s16, %s18_s16 }
   0xa   :  { %p1653_p3 = scmp.ne.s32.totalorder %s18_s16, %s1652_s24  ;;  %p1658_p5 = scmp.lt.s32.totalorder %s1652_s24, %s1652_s24 }
   0xc   :  { %p1659_p6 = por %p1658_p5, %p1657_p4 }
   0xe   :  { %p1660_p7 = pnand %p1659_p6, %p1653_p3 }
  0x10   :  { %1663 = shalt.err (!%p1660_p7)
}
  0x11   :  { %s1715_s25 = smov 128   ;;  %s1716_s26 = smov 8  }
  0x12   :  { %23 = dma.hbm_to_vmem [thread:$0]  %s2091_s0, 512, %s18_s16, [#allocation3], %s1715_s25, %s1715_s25, %s1716_s26  }
  0x13   :  { %s1717_s29 = smov [#allocation5]   ;;  %s1664_s7 = scalar_lea.hbm %s2092_s1, 24576 }
  0x14   :  { %s29_s30 = sshll.u32 %s1717_s29, 4  ;;  %p1665_p8 = scmp.ne.s32.totalorder %s2092_s1, %s1664_s7  ;;  %s30_s30 = int_to_ptr.vmem [resolvable:$true] %s29_s30 }
  0x15   :  { %p1668_p9 = scmp.lt.u32.totalorder %s1664_s7, %s2092_s1 }
  0x17   :  { %p1670_p10 = pnand %p1668_p9, %p1665_p8 }
  0x19   :  { %1673 = shalt.err (!%p1670_p10)
}
  0x1a   :  { %s1674_s12 = scalar_lea.vmem %s30_s30, 24576  ;;  %p1679_p12 = scmp.lt.s32.totalorder %s30_s30, %s30_s30 }
  0x1b   :  { %p1675_p11 = scmp.ne.s32.totalorder %s30_s30, %s1674_s12  ;;  %p1680_p13 = scmp.lt.s32.totalorder %s1674_s12, %s1674_s12 }
  0x1d   :  { %p1681_p0 = por %p1680_p13, %p1679_p12 }
  0x1f   :  { %p1682_p1 = pnand %p1681_p0, %p1675_p11 }
  0x21   :  { %1685 = shalt.err (!%p1682_p1)
}
  0x22   :  { %35 = dma.hbm_to_vmem [thread:$0]  %s2092_s1, 24576, %s30_s30, [#allocation6], %s1715_s25, %s1715_s25, %s1716_s26  }
  0x23   :  { %1708 = dma.done.wait [#allocation3], 512  }
  0x24   :  { %1709 = vsyncadd [#allocation3], 4294966784 }
  0x25   :  { %1710 = dma.done.wait [#allocation6], 24576  }
  0x26   :  { %1711 = vsyncadd [#allocation6], 4294942720  ;;  %v259_v0 = vld [vmem:[#allocation5 + $0x80] sm:$0xff]  ;;  %v260_v1 = vld [vmem:[#allocation5 + $0x88] sm:$0xff]  ;;  %v46_v43 = vlaneseq  ;;  %s1718_s21 = smov [#allocation7]  }
  0x27   :  { %v291_v2 = vld [vmem:[#allocation5 + $0x180] sm:$0xff]  ;;  %v1441_v3 = vpack.c.bf16 %v260_v1, %v259_v0  ;;  %v292_v4 = vld [vmem:[#allocation5 + $0x188] sm:$0xff]  ;;  %v261_v11 = vld [vmem:[#allocation5 + $0x90] sm:$0xff]  ;;  %s1142_s22 = sshll.u32 %s1718_s21, 4  ;;  %s1143_s22 = int_to_ptr.vmem [resolvable:$true] %s1142_s22 }
  0x28   :  { %v243_v5 = vld [vmem:[#allocation5] sm:$0xff]  ;;  %v244_v6 = vld [vmem:[#allocation5 + $0x8] sm:$0xff]  ;;  %v1473_v7 = vpack.c.bf16 %v292_v4, %v291_v2  ;;  %v262_v13 = vld [vmem:[#allocation5 + $0x98] sm:$0xff]  ;;  %v1774_v57 = vshrl.u32 %v46_v43, 7  ;;  %p1691_p3 = scmp.lt.s32.totalorder %s1143_s22, %s1143_s22 }
  0x29   :  { %v1443_v8 = vpack.c.bf16 %v244_v6, %v243_v5  ;;  %v275_v9 = vld [vmem:[#allocation5 + $0x100] sm:$0xff]  ;;  %v276_v10 = vld [vmem:[#allocation5 + $0x108] sm:$0xff]  ;;  %1442 = vmatprep.subr.bf16.mxu0 %v1441_v3  ;;  %v293_v14 = vld [vmem:[#allocation5 + $0x190] sm:$0xff]  ;;  %v1445_v16 = vpack.c.bf16 %v262_v13, %v261_v11 }
  0x2a   :  { %v1475_v12 = vpack.c.bf16 %v276_v10, %v275_v9  ;;  %v294_v15 = vld [vmem:[#allocation5 + $0x198] sm:$0xff]  ;;  %1474 = vmatprep.subr.bf16.mxu1 %v1473_v7  ;;  %v245_v18 = vld [vmem:[#allocation5 + $0x10] sm:$0xff]  ;;  %v263_v23 = vld [vmem:[#allocation5 + $0xa0] sm:$0xff]  ;;  %v1777_v6 = vand.u32 15, %v1774_v57  ;;  %vm107_vm0 = vcmp.lt.s32.totalorder %v1774_v57, 2  ;;  %vm116_vm1 = vcmp.lt.s32.totalorder %v1774_v57, 1 }
  0x2b   :  { %1444 = vmatpush3.bf16.msra.mxu0 %v1443_v8  ;;  %v1477_v17 = vpack.c.bf16 %v294_v15, %v293_v14  ;;  %v246_v19 = vld [vmem:[#allocation5 + $0x18] sm:$0xff]  ;;  %v277_v20 = vld [vmem:[#allocation5 + $0x110] sm:$0xff]  ;;  %v264_v24 = vld [vmem:[#allocation5 + $0xa8] sm:$0xff]  ;;  %vm125_vm4 = vcmp.lt.s32.totalorder %v1774_v57, 7  ;;  %vm134_vm11 = vcmp.lt.s32.totalorder %v1774_v57, 6 }
  0x2c   :  { %1476 = vmatpush3.bf16.msra.mxu1 %v1475_v12  ;;  %v1447_v21 = vpack.c.bf16 %v246_v19, %v245_v18  ;;  %v278_v22 = vld [vmem:[#allocation5 + $0x118] sm:$0xff]  ;;  %1446 = vmatprep.subr.bf16.mxu0 %v1445_v16  ;;  %v1449_v26 = vpack.c.bf16 %v264_v24, %v263_v23  ;;  %v295_v27 = vld [vmem:[#allocation5 + $0x1a0] sm:$0xff]  ;;  %v296_v28 = vld [vmem:[#allocation5 + $0x1a8] sm:$0xff]  ;;  %v1780_v13 = vadd.s32 4294967294, %v1777_v6  ;;  %v48_v23 = vadd.s32 8, %v1774_v57 }
  0x2d   :  { %1478 = vmatprep.subr.bf16.mxu1 %v1477_v17  ;;  %v1479_v25 = vpack.c.bf16 %v278_v22, %v277_v20  ;;  %v247_v29 = vld [vmem:[#allocation5 + $0x20] sm:$0xff]  ;;  %v1481_v30 = vpack.c.bf16 %v296_v28, %v295_v27  ;;  %v248_v31 = vld [vmem:[#allocation5 + $0x28] sm:$0xff]  ;;  %v265_v35 = vld [vmem:[#allocation5 + $0xb0] sm:$0xff]  ;;  %v49_v24 = vadd.s32 16, %v1774_v57  ;;  %vm139_vm3 = vcmp.eq.s32.totalorder %v1777_v6, 0 }
  0x2e   :  { %v279_v32 = vld [vmem:[#allocation5 + $0x120] sm:$0xff]  ;;  %v280_v33 = vld [vmem:[#allocation5 + $0x128] sm:$0xff]  ;;  %v1451_v34 = vpack.c.bf16 %v248_v31, %v247_v29  ;;  %v266_v36 = vld [vmem:[#allocation5 + $0xb8] sm:$0xff]  ;;  %vm167_vm2 = vcmp.ge.s32.totalorder %v1780_v13, 0 }
  0x2f   :  { %1448 = vmatpush3.bf16.msra.mxu0 %v1447_v21  ;;  %v297_v37 = vld [vmem:[#allocation5 + $0x1b0] sm:$0xff]  ;;  %v1483_v38 = vpack.c.bf16 %v280_v33, %v279_v32  ;;  %v1453_v39 = vpack.c.bf16 %v266_v36, %v265_v35  ;;  %v298_v40 = vld [vmem:[#allocation5 + $0x1b8] sm:$0xff]  ;;  %v267_v47 = vld [vmem:[#allocation5 + $0xc0] sm:$0xff] }
  0x30   :  { %1480 = vmatpush3.bf16.msra.mxu1 %v1479_v25  ;;  %1450 = vmatprep.subr.bf16.mxu0 %v1449_v26  ;;  %v249_v41 = vld [vmem:[#allocation5 + $0x30] sm:$0xff]  ;;  %v250_v42 = vld [vmem:[#allocation5 + $0x38] sm:$0xff]  ;;  %v1485_v44 = vpack.c.bf16 %v298_v40, %v297_v37  ;;  %v268_v48 = vld [vmem:[#allocation5 + $0xc8] sm:$0xff] }
  0x31   :  { %1482 = vmatprep.subr.bf16.mxu1 %v1481_v30  ;;  %v281_v45 = vld [vmem:[#allocation5 + $0x130] sm:$0xff]  ;;  %v282_v46 = vld [vmem:[#allocation5 + $0x138] sm:$0xff]  ;;  %v299_v49 = vld [vmem:[#allocation5 + $0x1c0] sm:$0xff]  ;;  %v1455_v51 = vpack.c.bf16 %v250_v42, %v249_v41  ;;  %v1457_v53 = vpack.c.bf16 %v268_v48, %v267_v47 }
  0x32   :  { %v300_v50 = vld [vmem:[#allocation5 + $0x1c8] sm:$0xff]  ;;  %v1487_v52 = vpack.c.bf16 %v282_v46, %v281_v45  ;;  %v251_v54 = vld [vmem:[#allocation5 + $0x40] sm:$0xff]  ;;  %v269_v60 = vld [vmem:[#allocation5 + $0xd0] sm:$0xff] }
  0x33   :  { %1452 = vmatpush3.bf16.msra.mxu0 %v1451_v34  ;;  %v252_v55 = vld [vmem:[#allocation5 + $0x48] sm:$0xff]  ;;  %v283_v56 = vld [vmem:[#allocation5 + $0x140] sm:$0xff]  ;;  %v1489_v58 = vpack.c.bf16 %v300_v50, %v299_v49  ;;  %v270_v61 = vld [vmem:[#allocation5 + $0xd8] sm:$0xff] }
  0x34   :  { %1484 = vmatpush3.bf16.msra.mxu1 %v1483_v38  ;;  %1454 = vmatprep.subr.bf16.mxu0 %v1453_v39  ;;  %v284_v59 = vld [vmem:[#allocation5 + $0x148] sm:$0xff]  ;;  %v301_v62 = vld [vmem:[#allocation5 + $0x1d0] sm:$0xff]  ;;  %v302_v63 = vld [vmem:[#allocation5 + $0x1d8] sm:$0xff]  ;;  %v1459_v0 = vpack.c.bf16 %v252_v55, %v251_v54  ;;  %v1461_v2 = vpack.c.bf16 %v270_v61, %v269_v60  ;;  %v1835_v60 = vadd.s32 4294967295, %v1777_v6 }
  0x35   :  { %1486 = vmatprep.subr.bf16.mxu1 %v1485_v44  ;;  %v1491_v1 = vpack.c.bf16 %v284_v59, %v283_v56  ;;  %v253_v3 = vld [vmem:[#allocation5 + $0x50] sm:$0xff]  ;;  %v254_v4 = vld [vmem:[#allocation5 + $0x58] sm:$0xff]  ;;  %v1493_v7 = vpack.c.bf16 %v302_v63, %v301_v62  ;;  %v271_v9 = vld [vmem:[#allocation5 + $0xe0] sm:$0xff] }
  0x36   :  { %v285_v5 = vld [vmem:[#allocation5 + $0x150] sm:$0xff]  ;;  %v286_v8 = vld [vmem:[#allocation5 + $0x158] sm:$0xff]  ;;  %v272_v10 = vld [vmem:[#allocation5 + $0xe8] sm:$0xff]  ;;  %v1463_v14 = vpack.c.bf16 %v254_v4, %v253_v3  ;;  %vm187_vm7 = vcmp.ge.s32.totalorder %v1835_v60, 0 }
  0x37   :  { %1456 = vmatpush3.bf16.msra.mxu0 %v1455_v51  ;;  %v303_v11 = vld [vmem:[#allocation5 + $0x1e0] sm:$0xff]  ;;  %v304_v12 = vld [vmem:[#allocation5 + $0x1e8] sm:$0xff]  ;;  %v1495_v18 = vpack.c.bf16 %v286_v8, %v285_v5  ;;  %v1465_v19 = vpack.c.bf16 %v272_v10, %v271_v9  ;;  %v1786_v22 = vld [vmem:[#allocation2 + $0x18] sm:$0xff]  ;;  %v1818_v51 = vand.u32 15, %v48_v23 }
  0x38   :  { %1488 = vmatpush3.bf16.msra.mxu1 %v1487_v52  ;;  %1458 = vmatprep.subr.bf16.mxu0 %v1457_v53  ;;  %v255_v15 = vld [vmem:[#allocation5 + $0x60] sm:$0xff]  ;;  %v256_v16 = vld [vmem:[#allocation5 + $0x68] sm:$0xff]  ;;  %v1497_v25 = vpack.c.bf16 %v304_v12, %v303_v11  ;;  %v273_v26 = vld [vmem:[#allocation5 + $0xf0] sm:$0xff]  ;;  %v106_v29 = vrot.slane %v1786_v22, 6  ;;  %v115_v35 = vrot.slane %v1786_v22, 7  ;;  %v1821_v53 = vand.u32 15, %v49_v24 }
  0x39   :  { %1490 = vmatprep.subr.bf16.mxu1 %v1489_v58  ;;  %v287_v17 = vld [vmem:[#allocation5 + $0x160] sm:$0xff]  ;;  %v288_v20 = vld [vmem:[#allocation5 + $0x168] sm:$0xff]  ;;  %v274_v27 = vld [vmem:[#allocation5 + $0xf8] sm:$0xff]  ;;  %v1467_v32 = vpack.c.bf16 %v256_v16, %v255_v15  ;;  %v50_v58 = vadd.s32 24, %v1774_v57  ;;  %vm148_vm5 = vcmp.eq.s32.totalorder %v1818_v51, 15  ;;  %v124_v11 = vrot.slane %v1786_v22, 1 }
  0x3a   :  { %v1784_v21 = vld [vmem:[#allocation2] sm:$0xff]  ;;  %v1793_v30 = vld [vmem:[#allocation2 + $0x8] sm:$0xff]  ;;  %v305_v33 = vld [vmem:[#allocation5 + $0x1f0] sm:$0xff]  ;;  %v1499_v40 = vpack.c.bf16 %v288_v20, %v287_v17  ;;  %v1469_v41 = vpack.c.bf16 %v274_v27, %v273_v26  ;;  %vm141_vm6 = vcmp.eq.s32.totalorder %v1821_v53, 0 }
  0x3b   :  { %1460 = vmatpush3.bf16.msra.mxu0 %v1459_v0  ;;  %v103_v28 = vrot.slane %v1784_v21, 6  ;;  %488 = vmatprep.mubr.f32.mxu1 %v1784_v21  ;;  %v112_v31 = vrot.slane %v1784_v21, 7  ;;  %v306_v34 = vld [vmem:[#allocation5 + $0x1f8] sm:$0xff]  ;;  %v121_v37 = vrot.slane %v1784_v21, 1  ;;  %v122_v38 = vrot.slane %v1793_v30, 1  ;;  %v257_v42 = vld [vmem:[#allocation5 + $0x70] sm:$0xff] }
  0x3c   :  { %1492 = vmatpush3.bf16.msra.mxu1 %v1491_v1  ;;  %1462 = vmatprep.subr.bf16.mxu0 %v1461_v2  ;;  %v113_v39 = vrot.slane %v1793_v30, 7  ;;  %v258_v43 = vld [vmem:[#allocation5 + $0x78] sm:$0xff]  ;;  %v289_v44 = vld [vmem:[#allocation5 + $0x170] sm:$0xff]  ;;  %v1501_v46 = vpack.c.bf16 %v306_v34, %v305_v33  ;;  %v323_v49 = vld [vmem:[#allocation5 + $0x280] sm:$0xff]  ;;  %v104_v3 = vrot.slane %v1793_v30, 6  ;;  %v1852_v12 = vand.u32 15, %v50_v58 }
  0x3d   :  { %1494 = vmatprep.subr.bf16.mxu1 %v1493_v7  ;;  %v111_v36 = vsel %vm107_vm0, %v106_v29, %v103_v28  ;;  %v120_v45 = vsel %vm116_vm1, %v115_v35, %v112_v31  ;;  %v290_v47 = vld [vmem:[#allocation5 + $0x178] sm:$0xff]  ;;  %v324_v50 = vld [vmem:[#allocation5 + $0x288] sm:$0xff]  ;;  %v1471_v54 = vpack.c.bf16 %v258_v43, %v257_v42  ;;  %v1827_v55 = vsel %vm125_vm4, %v121_v37, %v122_v38  ;;  %v307_v62 = vld [vmem:[#allocation5 + $0x200] sm:$0xff] }
  0x3e   :  { %1155 = vmatprep.mubr.msk.f32.mxu0 %vm167_vm2, %v111_v36  ;;  %v143_v48 = vsel %vm139_vm3, %v1784_v21, %v120_v45  ;;  %v1831_v56 = vsel %vm116_vm1, %v112_v31, %v113_v39  ;;  %v1503_v59 = vpack.c.bf16 %v290_v47, %v289_v44  ;;  %v1505_v61 = vpack.c.bf16 %v324_v50, %v323_v49  ;;  %v308_v63 = vld [vmem:[#allocation5 + $0x208] sm:$0xff]  ;;  %v1837_v0 = vld [vmem:[#allocation2 + $0x10] sm:$0xff]  ;;  %v326_v2 = vld [vmem:[#allocation5 + $0x298] sm:$0xff] }
  0x3f   :  { %1464 = vmatpush3.bf16.msra.mxu0 %v1463_v14  ;;  %v155_v52 = vmax.f32 %v143_v48, %v1784_v21  ;;  %v325_v1 = vld [vmem:[#allocation5 + $0x290] sm:$0xff]  ;;  %v123_v4 = vrot.slane %v1837_v0, 1  ;;  %v156_v7 = vmax.f32 %v1831_v56, %v1793_v30  ;;  %v114_v8 = vrot.slane %v1837_v0, 7  ;;  %v310_v16 = vld [vmem:[#allocation5 + $0x218] sm:$0xff]  ;;  %v328_v20 = vld [vmem:[#allocation5 + $0x2a8] sm:$0xff] }
  0x40   :  { %1496 = vmatpush3.bf16.msra.mxu1 %v1495_v18  ;;  %1466 = vmatprep.subr.bf16.mxu0 %v1465_v19  ;;  %v1507_v9 = vpack.c.bf16 %v308_v63, %v307_v62  ;;  %v1509_v14 = vpack.c.bf16 %v326_v2, %v325_v1  ;;  %v309_v15 = vld [vmem:[#allocation5 + $0x210] sm:$0xff]  ;;  %v327_v19 = vld [vmem:[#allocation5 + $0x2a0] sm:$0xff]  ;;  %v110_v23 = vsel %vm107_vm0, %v103_v28, %v104_v3  ;;  %v105_v24 = vrot.slane %v1837_v0, 6  ;;  %v330_v42 = vld [vmem:[#allocation5 + $0x2b8] sm:$0xff] }
  0x41   :  { %1498 = vmatprep.subr.bf16.mxu1 %v1497_v25  ;;  %v159_v5 = vmax.f32 %v155_v52, %v1827_v55  ;;  %v1849_v10 = vsel %vm125_vm4, %v122_v38, %v123_v4  ;;  %v118_v18 = vsel %vm116_vm1, %v113_v39, %v114_v8  ;;  %v1867_v25 = vadd.s32 4294967294, %v1821_v53  ;;  %v311_v36 = vld [vmem:[#allocation5 + $0x220] sm:$0xff]  ;;  %v312_v38 = vld [vmem:[#allocation5 + $0x228] sm:$0xff]  ;;  %v313_v47 = vld [vmem:[#allocation5 + $0x230] sm:$0xff] }
  0x42   :  { %v152_v17 = vsel %vm148_vm5, %v1793_v30, %v1849_v10  ;;  %v145_v26 = vsel %vm141_vm6, %v1837_v0, %v118_v18  ;;  %v1877_v28 = vsel %vm125_vm4, %v123_v4, %v124_v11  ;;  %v117_v33 = vsel %vm116_vm1, %v114_v8, %v115_v35  ;;  %v314_v48 = vld [vmem:[#allocation5 + $0x238] sm:$0xff]  ;;  %v331_v49 = vld [vmem:[#allocation5 + $0x2c0] sm:$0xff]  ;;  %v332_v50 = vld [vmem:[#allocation5 + $0x2c8] sm:$0xff] }
  0x43   :  { %1468 = vmatpush3.bf16.msra.mxu0 %v1467_v32  ;;  %v160_v27 = vmax.f32 %v156_v7, %v152_v17  ;;  %v157_v31 = vmax.f32 %v145_v26, %v1837_v0  ;;  %v1511_v32 = vpack.c.bf16 %v310_v16, %v309_v15  ;;  %v1513_v34 = vpack.c.bf16 %v328_v20, %v327_v19  ;;  %v315_v62 = vld [vmem:[#allocation5 + $0x240] sm:$0xff]  ;;  %v316_v63 = vld [vmem:[#allocation5 + $0x248] sm:$0xff]  ;;  %v333_v1 = vld [vmem:[#allocation5 + $0x2d0] sm:$0xff] }
  0x44   :  { %1500 = vmatpush3.bf16.msra.mxu1 %v1499_v40  ;;  %1470 = vmatprep.subr.bf16.mxu0 %v1469_v41  ;;  %v1884_v39 = vadd.s32 4294967295, %v1821_v53  ;;  %v1890_v40 = vsel %vm125_vm4, %v124_v11, %v121_v37  ;;  %vm150_vm8 = vcmp.eq.s32.totalorder %v1852_v12, 15  ;;  %v329_v41 = vld [vmem:[#allocation5 + $0x2b0] sm:$0xff]  ;;  %v109_v35 = vsel %vm107_vm0, %v104_v3, %v105_v24  ;;  %v318_v4 = vld [vmem:[#allocation5 + $0x258] sm:$0xff]  ;;  %v336_v7 = vld [vmem:[#allocation5 + $0x2e8] sm:$0xff] }
  0x45   :  { %1502 = vmatprep.subr.bf16.mxu1 %v1501_v46  ;;  %vm169_vm9 = vcmp.ge.s32.totalorder %v1867_v25, 0  ;;  %v161_v43 = vmax.f32 %v157_v31, %v1877_v28  ;;  %v158_v44 = vmax.f32 %v117_v33, %v1786_v22  ;;  %v154_v37 = vsel %vm150_vm8, %v1786_v22, %v1890_v40  ;;  %v317_v3 = vld [vmem:[#allocation5 + $0x250] sm:$0xff]  ;;  %v319_v11 = vld [vmem:[#allocation5 + $0x260] sm:$0xff]  ;;  %v338_v16 = vld [vmem:[#allocation5 + $0x2f8] sm:$0xff] }
  0x46   :  { %v1517_v46 = vpack.c.bf16 %v330_v42, %v329_v41  ;;  %vm189_vm10 = vcmp.ge.s32.totalorder %v1884_v39, 0  ;;  %v108_v52 = vsel %vm107_vm0, %v105_v24, %v106_v29  ;;  %v334_v29 = vld [vmem:[#allocation5 + $0x2d8] sm:$0xff]  ;;  %v1527_v8 = vpack.c.bf16 %v318_v4, %v317_v3  ;;  %v337_v15 = vld [vmem:[#allocation5 + $0x2f0] sm:$0xff]  ;;  %v753_v41 = vld [vmem:[#allocation5 + $0x408] sm:$0xff] }
  0x47   :  { %1472 = vmatpush3.bf16.msra.mxu0 %v1471_v54  ;;  %v130_v54 = vrot.slane %v1784_v21, 2  ;;  %v162_v58 = vmax.f32 %v158_v44, %v154_v37  ;;  %v1525_v2 = vpack.c.bf16 %v334_v29, %v333_v1  ;;  %v321_v19 = vld [vmem:[#allocation5 + $0x270] sm:$0xff]  ;;  %v322_v20 = vld [vmem:[#allocation5 + $0x278] sm:$0xff]  ;;  %v132_v24 = vrot.slane %v1837_v0, 2  ;;  %v720_v37 = vld [vmem:[#allocation5 + $0x300] sm:$0xff] }
  0x48   :  { %1504 = vmatpush3.bf16.msra.mxu1 %v1503_v59  ;;  %1506 = vmatprep.subr.bf16.mxu0 %v1505_v61  ;;  %v1519_v59 = vpack.c.bf16 %v314_v48, %v313_v47  ;;  %v1521_v61 = vpack.c.bf16 %v332_v50, %v331_v49  ;;  %v1922_v26 = vadd.s32 2, %v1818_v51  ;;  %v754_v49 = vld [vmem:[#allocation5 + $0x410] sm:$0xff]  ;;  %v755_v50 = vld [vmem:[#allocation5 + $0x418] sm:$0xff]  ;;  %v756_v29 = vld [vmem:[#allocation5 + $0x420] sm:$0xff] }
  0x49   :  { %v741_v3 = vld [vmem:[#allocation5 + $0x3a8] sm:$0xff]  ;;  %v774_v4 = vld [vmem:[#allocation5 + $0x4b0] sm:$0xff]  ;;  %v787_v53 = vld [vmem:[#allocation5 + $0x518] sm:$0xff] }
  0x4a   :  { %404 = vmatmul.mubr.f32.vlgmr.msra.gmra.mrb[0].mxu0 %v159_v5  ;;  %v335_v5 = vld [vmem:[#allocation5 + $0x2e0] sm:$0xff]  ;;  %vm232_vm12 = vcmp.lt.s32.totalorder %v1922_v26, 16  ;;  %v790_v39 = vld [vmem:[#allocation5 + $0x530] sm:$0xff] }
  0x4b   :  { %1157 = vmatmul.mubr.msk.f32.vlgmr.msra.gmra.mrb[0].mxu1 %vm187_vm7, %v120_v45  ;;  %1508 = vmatpush3.bf16.msra.mxu0 %v1507_v9  ;;  %v1515_v45 = vpack.c.bf16 %v312_v38, %v311_v36  ;;  %v1529_v9 = vpack.c.bf16 %v336_v7, %v335_v5  ;;  %v752_v38 = vld [vmem:[#allocation5 + $0x400] sm:$0xff]  ;;  %v775_v7 = vld [vmem:[#allocation5 + $0x4b8] sm:$0xff] }
  0x4c   :  { %1510 = vmatprep.subr.bf16.mxu0 %v1509_v14  ;;  %408 = vmatprep.mubr.f32.mxu0 %v110_v23  ;;  %v320_v14 = vld [vmem:[#allocation5 + $0x268] sm:$0xff]  ;;  %v1535_v23 = vpack.c.bf16 %v322_v20, %v321_v19  ;;  %v1571_v42 = vpack.c.bf16 %v753_v41, %v752_v38  ;;  %v743_v19 = vld [vmem:[#allocation5 + $0x3b8] sm:$0xff]  ;;  %v776_v20 = vld [vmem:[#allocation5 + $0x4c0] sm:$0xff] }
  0x4d   :  { %493 = vmatprep.mubr.f32.mxu1 %v1793_v30  ;;  %v1531_v17 = vpack.c.bf16 %v320_v14, %v319_v11  ;;  %v1581_v11 = vpack.c.bf16 %v775_v7, %v774_v4  ;;  %v744_v38 = vld [vmem:[#allocation5 + $0x3c0] sm:$0xff]  ;;  %v745_v41 = vld [vmem:[#allocation5 + $0x3c8] sm:$0xff] }
  0x4e   :  { %409 = vmatmul.mubr.f32.gmra.mrb[2].mxu0 %v160_v27  ;;  %v1925_v27 = vadd.s32 1, %v1818_v51  ;;  %v732_v4 = vld [vmem:[#allocation5 + $0x360] sm:$0xff] }
  0x4f   :  { %1512 = vmatpush3.bf16.msra.mxu0 %v1511_v32  ;;  %494 = vmatmul.mubr.f32.gmra.mrb[2].mxu1 %v1831_v56  ;;  %v131_v56 = vrot.slane %v1793_v30, 2  ;;  %v1523_v30 = vpack.c.bf16 %v316_v63, %v315_v62  ;;  %v133_v32 = vrot.slane %v1786_v22, 2  ;;  %v723_v62 = vld [vmem:[#allocation5 + $0x318] sm:$0xff] }
  0x50   :  { %1514 = vmatprep.subr.bf16.mxu0 %v1513_v34  ;;  %1156 = vmatprep.mubr.msk.f32.mxu0 %vm169_vm9, %v109_v35  ;;  %vm212_vm13 = vcmp.lt.s32.totalorder %v1925_v27, 16  ;;  %v769_v34 = vld [vmem:[#allocation5 + $0x488] sm:$0xff]  ;;  %v736_v35 = vld [vmem:[#allocation5 + $0x380] sm:$0xff] }
  0x51   :  { %498 = vmatprep.mubr.f32.mxu1 %v1837_v0  ;;  %v137_v21 = vsel %vm134_vm11, %v130_v54, %v131_v56  ;;  %v136_v31 = vsel %vm134_vm11, %v131_v56, %v132_v24  ;;  %v135_v0 = vsel %vm134_vm11, %v132_v24, %v133_v32  ;;  %v772_v56 = vld [vmem:[#allocation5 + $0x4a0] sm:$0xff]  ;;  %v777_v24 = vld [vmem:[#allocation5 + $0x4c8] sm:$0xff] }
  0x52   :  { %414 = vmatmul.mubr.f32.gmra.mrb[4].mxu0 %v161_v43  ;;  %v737_v43 = vld [vmem:[#allocation5 + $0x388] sm:$0xff] }
  0x53   :  { %1516 = vmatpush3.bf16.msra.mxu0 %v1515_v45  ;;  %1158 = vmatmul.mubr.msk.f32.gmra.mrb[4].mxu1 %vm189_vm10, %v118_v18  ;;  %v1533_v18 = vpack.c.bf16 %v338_v16, %v337_v15  ;;  %v1537_v44 = vpack.c.bf16 %v737_v43, %v736_v35  ;;  %v771_v45 = vld [vmem:[#allocation5 + $0x498] sm:$0xff]  ;;  %v758_v15 = vld [vmem:[#allocation5 + $0x430] sm:$0xff]  ;;  %v1553_v35 = vpack.c.bf16 %v745_v41, %v744_v38 }
  0x54   :  { %1518 = vmatprep.subr.bf16.mxu0 %v1517_v46  ;;  %418 = vmatprep.mubr.f32.mxu0 %v108_v52  ;;  %v721_v46 = vld [vmem:[#allocation5 + $0x308] sm:$0xff]  ;;  %v738_v52 = vld [vmem:[#allocation5 + $0x390] sm:$0xff]  ;;  %v759_v16 = vld [vmem:[#allocation5 + $0x438] sm:$0xff] }
  0x55   :  { %503 = vmatprep.mubr.f32.mxu1 %v1786_v22  ;;  %v1944_v22 = vadd.s32 1, %v1852_v12  ;;  %v1539_v48 = vpack.c.bf16 %v721_v46, %v720_v37  ;;  %1538 = vmatprep.subr.bf16.mxu1 %v1537_v44  ;;  %v779_v43 = vld [vmem:[#allocation5 + $0x4d8] sm:$0xff]  ;;  %v729_v44 = vld [vmem:[#allocation5 + $0x348] sm:$0xff]  ;;  %v762_v46 = vld [vmem:[#allocation5 + $0x450] sm:$0xff] }
  0x56   :  { %419 = vmatmul.mubr.f32.gmra.mrb[6].mxu0 %v162_v58 }
  0x57   :  { %1520 = vmatpush3.bf16.msra.mxu0 %v1519_v59  ;;  %504 = vmatmul.mubr.f32.gmra.mrb[6].mxu1 %v117_v33  ;;  %v1938_v33 = vadd.s32 2, %v1852_v12  ;;  %vm214_vm15 = vcmp.lt.s32.totalorder %v1944_v22, 16  ;;  %v773_v59 = vld [vmem:[#allocation5 + $0x4a8] sm:$0xff] }
  0x58   :  { %1522 = vmatprep.subr.bf16.mxu0 %v1521_v61  ;;  %573 = vmatprep.mubr.f32.mxu0 %v137_v21  ;;  %v722_v61 = vld [vmem:[#allocation5 + $0x310] sm:$0xff]  ;;  %v1577_v63 = vpack.c.bf16 %v773_v59, %v772_v56  ;;  %v757_v21 = vld [vmem:[#allocation5 + $0x428] sm:$0xff]  ;;  %v731_v59 = vld [vmem:[#allocation5 + $0x358] sm:$0xff] }
  0x59   :  { %vm234_vm14 = vcmp.lt.s32.totalorder %v1938_v33, 16  ;;  %1540 = vmatpush3.bf16.msra.mxu1 %v1539_v48  ;;  %v1543_v1 = vpack.c.bf16 %v723_v62, %v722_v61  ;;  %v730_v56 = vld [vmem:[#allocation5 + $0x350] sm:$0xff]  ;;  %v764_v61 = vld [vmem:[#allocation5 + $0x460] sm:$0xff]  ;;  %v765_v62 = vld [vmem:[#allocation5 + $0x468] sm:$0xff] }
  0x5b   :  { %1524 = vmatpush3.bf16.msra.mxu0 %v1523_v30  ;;  %v1579_v30 = vpack.c.bf16 %v757_v21, %v756_v29  ;;  %v748_v29 = vld [vmem:[#allocation5 + $0x3e0] sm:$0xff]  ;;  %v749_v21 = vld [vmem:[#allocation5 + $0x3e8] sm:$0xff] }
  0x5c   :  { %1526 = vmatprep.subr.bf16.mxu0 %v1525_v2  ;;  %v740_v2 = vld [vmem:[#allocation5 + $0x3a0] sm:$0xff] }
  0x5d   :  { %v1545_v5 = vpack.c.bf16 %v741_v3, %v740_v2  ;;  %v1561_v2 = vpack.c.bf16 %v749_v21, %v748_v29  ;;  %v783_v3 = vld [vmem:[#allocation5 + $0x4f8] sm:$0xff] }
  0x5f   :  { %1528 = vmatpush3.bf16.msra.mxu0 %v1527_v8  ;;  %v724_v8 = vld [vmem:[#allocation5 + $0x320] sm:$0xff] }
  0x60   :  { %1530 = vmatprep.subr.bf16.mxu0 %v1529_v9  ;;  %v725_v9 = vld [vmem:[#allocation5 + $0x328] sm:$0xff] }
  0x61   :  { %v1547_v14 = vpack.c.bf16 %v725_v9, %v724_v8  ;;  %v766_v9 = vld [vmem:[#allocation5 + $0x470] sm:$0xff] }
  0x63   :  { %1532 = vmatpush3.bf16.msra.mxu0 %v1531_v17  ;;  %v1583_v17 = vpack.c.bf16 %v759_v16, %v758_v15  ;;  %v750_v15 = vld [vmem:[#allocation5 + $0x3f0] sm:$0xff]  ;;  %v751_v16 = vld [vmem:[#allocation5 + $0x3f8] sm:$0xff] }
  0x64   :  { %1534 = vmatprep.subr.bf16.mxu0 %v1533_v18  ;;  %v742_v18 = vld [vmem:[#allocation5 + $0x3b0] sm:$0xff] }
  0x67   :  { %1536 = vmatpush3.bf16.msra.mxu0 %v1535_v23  ;;  %v1549_v23 = vpack.c.bf16 %v743_v19, %v742_v18  ;;  %v734_v18 = vld [vmem:[#allocation5 + $0x370] sm:$0xff]  ;;  %v735_v19 = vld [vmem:[#allocation5 + $0x378] sm:$0xff] }
  0x6a   :  { %574 = vmatmul.mubr.f32.vlgmr.msra.gmra.mrb[8].mxu0 %v1827_v55  ;;  %v138_v55 = vsel %vm134_vm11, %v133_v32, %v130_v54  ;;  %v739_v54 = vld [vmem:[#allocation5 + $0x398] sm:$0xff] }
  0x6b   :  { %1159 = vmatprep.mubr.msk.f32.mxu0 %vm232_vm12, %v136_v31  ;;  %v1541_v58 = vpack.c.bf16 %v739_v54, %v738_v52  ;;  %v726_v31 = vld [vmem:[#allocation5 + $0x330] sm:$0xff]  ;;  %v727_v32 = vld [vmem:[#allocation5 + $0x338] sm:$0xff]  ;;  %v781_v54 = vld [vmem:[#allocation5 + $0x4e8] sm:$0xff] }
  0x6d   :  { %1542 = vmatprep.subr.bf16.mxu1 %v1541_v58 }
  0x6e   :  { %1160 = vmatmul.mubr.msk.f32.gmra.mrb[10].mxu0 %vm212_vm13, %v1849_v10  ;;  %v768_v10 = vld [vmem:[#allocation5 + $0x480] sm:$0xff]  ;;  %1544 = vmatpush3.bf16.msra.mxu1 %v1543_v1  ;;  %v1595_v1 = vpack.c.bf16 %v765_v62, %v764_v61 }
  0x6f   :  { %583 = vmatprep.mubr.f32.mxu0 %v135_v0  ;;  %v1569_v36 = vpack.c.bf16 %v769_v34, %v768_v10  ;;  %1546 = vmatprep.subr.bf16.mxu1 %v1545_v5  ;;  %v1585_v0 = vpack.c.bf16 %v777_v24, %v776_v20  ;;  %v760_v10 = vld [vmem:[#allocation5 + $0x440] sm:$0xff]  ;;  %v761_v34 = vld [vmem:[#allocation5 + $0x448] sm:$0xff]  ;;  %v1567_v20 = vpack.c.bf16 %v735_v19, %v734_v18 }
  0x70   :  { %v733_v5 = vld [vmem:[#allocation5 + $0x368] sm:$0xff] }
  0x71   :  { %1570 = vmatprep.subr.bf16.mxu0 %v1569_v36  ;;  %v1587_v36 = vpack.c.bf16 %v761_v34, %v760_v10  ;;  %v1563_v8 = vpack.c.bf16 %v733_v5, %v732_v4  ;;  %v801_v24 = vld [vmem:[#allocation5 + $0x588] sm:$0xff] }
  0x72   :  { %584 = vmatmul.mubr.f32.gmra.mrb[12].mxu0 %v1877_v28  ;;  %v770_v28 = vld [vmem:[#allocation5 + $0x490] sm:$0xff]  ;;  %1548 = vmatpush3.bf16.msra.mxu1 %v1547_v14 }
  0x73   :  { %1161 = vmatprep.mubr.msk.f32.mxu0 %vm234_vm14, %v138_v55  ;;  %1572 = vmatpush3.bf16.msra.mxu0 %v1571_v42  ;;  %v1573_v47 = vpack.c.bf16 %v771_v45, %v770_v28  ;;  %v1551_v55 = vpack.c.bf16 %v727_v32, %v726_v31  ;;  %v778_v42 = vld [vmem:[#allocation5 + $0x4d0] sm:$0xff]  ;;  %v728_v28 = vld [vmem:[#allocation5 + $0x340] sm:$0xff] }
  0x74   :  { %1550 = vmatprep.subr.bf16.mxu1 %v1549_v23  ;;  %v1589_v45 = vpack.c.bf16 %v779_v43, %v778_v42  ;;  %v1555_v37 = vpack.c.bf16 %v729_v44, %v728_v28  ;;  %v800_v23 = vld [vmem:[#allocation5 + $0x580] sm:$0xff] }
  0x75   :  { %1574 = vmatprep.subr.bf16.mxu0 %v1573_v47  ;;  %v763_v47 = vld [vmem:[#allocation5 + $0x458] sm:$0xff]  ;;  %v1601_v31 = vpack.c.bf16 %v801_v24, %v800_v23 }
  0x76   :  { %1162 = vmatmul.mubr.msk.f32.gmra.mrb[14].mxu0 %vm214_vm15, %v1890_v40  ;;  %v1575_v40 = vpack.c.bf16 %v755_v50, %v754_v49  ;;  %1552 = vmatpush3.bf16.msra.mxu1 %v1551_v55  ;;  %v1591_v48 = vpack.c.bf16 %v763_v47, %v762_v46  ;;  %v746_v49 = vld [vmem:[#allocation5 + $0x3d0] sm:$0xff]  ;;  %v747_v50 = vld [vmem:[#allocation5 + $0x3d8] sm:$0xff] }
  0x77   :  { %1554 = vmatprep.subr.bf16.mxu1 %v1553_v35  ;;  %v1557_v52 = vpack.c.bf16 %v747_v50, %v746_v49 }
  0x78   :  { %1576 = vmatpush3.bf16.msra.mxu0 %v1575_v40  ;;  %v780_v40 = vld [vmem:[#allocation5 + $0x4e0] sm:$0xff] }
  0x79   :  { %1578 = vmatprep.subr.bf16.mxu0 %v1577_v63  ;;  %v1593_v58 = vpack.c.bf16 %v781_v54, %v780_v40  ;;  %v1559_v63 = vpack.c.bf16 %v731_v59, %v730_v56 }
  0x7a   :  { %1556 = vmatpush3.bf16.msra.mxu1 %v1555_v37 }
  0x7b   :  { %1558 = vmatprep.subr.bf16.mxu1 %v1557_v52 }
  0x7c   :  { %1580 = vmatpush3.bf16.msra.mxu0 %v1579_v30  ;;  %v782_v30 = vld [vmem:[#allocation5 + $0x4f0] sm:$0xff] }
  0x7d   :  { %1582 = vmatprep.subr.bf16.mxu0 %v1581_v11  ;;  %v1597_v7 = vpack.c.bf16 %v783_v3, %v782_v30  ;;  %v767_v11 = vld [vmem:[#allocation5 + $0x478] sm:$0xff] }
  0x7e   :  { %1560 = vmatpush3.bf16.msra.mxu1 %v1559_v63  ;;  %v1599_v14 = vpack.c.bf16 %v767_v11, %v766_v9 }
  0x7f   :  { %1562 = vmatprep.subr.bf16.mxu1 %v1561_v2 }
  0x80   :  { %1584 = vmatpush3.bf16.msra.mxu0 %v1583_v17  ;;  %v1565_v17 = vpack.c.bf16 %v751_v16, %v750_v15 }
  0x81   :  { %1586 = vmatprep.subr.bf16.mxu0 %v1585_v0 }
  0x82   :  { %1564 = vmatpush3.bf16.msra.mxu1 %v1563_v8 }
  0x83   :  { %1566 = vmatprep.subr.bf16.mxu1 %v1565_v17 }
  0x84   :  { %1588 = vmatpush3.bf16.msra.mxu0 %v1587_v36 }
  0x85   :  { %1590 = vmatprep.subr.bf16.mxu0 %v1589_v45 }
  0x86   :  { %1568 = vmatpush3.bf16.msra.mxu1 %v1567_v20 }
  0x87   :  { %1602 = vmatprep.subr.bf16.mxu1 %v1601_v31 }
  0x88   :  { %1592 = vmatpush3.bf16.msra.mxu0 %v1591_v48 }
  0x89   :  { %1594 = vmatprep.subr.bf16.mxu0 %v1593_v58 }
  0x8c   :  { %1596 = vmatpush3.bf16.msra.mxu0 %v1595_v1 }
  0x8d   :  { %1598 = vmatprep.subr.bf16.mxu0 %v1597_v7 }
  0x90   :  { %1600 = vmatpush3.bf16.msra.mxu0 %v1599_v14 }
 0x11d   :  { %v1209_v32 = vpop.f32.mrb[0].mxu0 }
 0x11e   :  { %v1253_v0 = vpop.f32.mrb[0].mxu1  ;;  %v1210_v55 = vpop.f32.mrb[1].mxu0 }
 0x11f   :  { %v1211_v10 = vadd.f32 %v1210_v55, %v1209_v32  ;;  %v1254_v34 = vpop.f32.mrb[1].mxu1 }
 0x120   :  { %v1255_v36 = vadd.f32 %v1254_v34, %v1253_v0 }
 0x121   :  { %v1212_v38 = vpop.f32.mrb[2].mxu0 }
 0x122   :  { %v491_v41 = vadd.f32 %v1255_v36, %v1211_v10  ;;  %v1256_v42 = vpop.f32.mrb[2].mxu1  ;;  %v1213_v35 = vpop.f32.mrb[3].mxu0 }
 0x123   :  { %v1214_v43 = vadd.f32 %v1213_v35, %v1212_v38  ;;  %v1257_v28 = vpop.f32.mrb[3].mxu1 }
 0x124   :  { %v1258_v44 = vadd.f32 %v1257_v28, %v1256_v42 }
 0x125   :  { %v1215_v45 = vpop.f32.mrb[4].mxu0 }
 0x126   :  { %v496_v37 = vadd.f32 %v1258_v44, %v1214_v43  ;;  %v1259_v46 = vpop.f32.mrb[4].mxu1  ;;  %v1216_v47 = vpop.f32.mrb[5].mxu0 }
 0x127   :  { %v1217_v48 = vadd.f32 %v1216_v47, %v1215_v45  ;;  %v1260_v49 = vpop.f32.mrb[5].mxu1 }
 0x128   :  { %v1261_v50 = vadd.f32 %v1260_v49, %v1259_v46 }
 0x129   :  { %v1218_v40 = vpop.f32.mrb[6].mxu0 }
 0x12a   :  { %v501_v52 = vadd.f32 %v1261_v50, %v1217_v48  ;;  %v1262_v54 = vpop.f32.mrb[6].mxu1  ;;  %v1219_v56 = vpop.f32.mrb[7].mxu0 }
 0x12b   :  { %v1220_v58 = vadd.f32 %v1219_v56, %v1218_v40  ;;  %v1263_v59 = vpop.f32.mrb[7].mxu1  ;;  %v1163_v56 = vld [vmem:[%s2093_s2] ss:$0 sm:$0xff] }
 0x12c   :  { %v1264_v61 = vadd.f32 %v1263_v59, %v1262_v54 }
 0x12e   :  { %v506_v62 = vadd.f32 %v1264_v61, %v1220_v58 }
 0x13d   :  { %v1297_v63 = vpop.f32.mrb[8].mxu0 }
 0x13e   :  { %v1298_v1 = vpop.f32.mrb[9].mxu0 }
 0x13f   :  { %v1299_v29 = vadd.f32 %v1298_v1, %v1297_v63  ;;  %v1164_v63 = vld [vmem:[%s2094_s3] ss:$0 sm:$0xff] }
 0x141   :  { %v576_v21 = vadd.f32 %v1299_v29, %v491_v41  ;;  %v1300_v30 = vpop.f32.mrb[10].mxu0 }
 0x142   :  { %v1301_v2 = vpop.f32.mrb[11].mxu0 }
 0x143   :  { %v1302_v3 = vadd.f32 %v1301_v2, %v1300_v30  ;;  %v784_v2 = vld [vmem:[#allocation5 + $0x500] sm:$0xff] }
 0x145   :  { %v581_v4 = vadd.f32 %v1302_v3, %v496_v37  ;;  %v1303_v5 = vpop.f32.mrb[12].mxu0 }
 0x146   :  { %v1304_v7 = vpop.f32.mrb[13].mxu0 }
 0x147   :  { %v594_v8 = vadd.f32 %v581_v4, %v576_v21  ;;  %v1305_v9 = vadd.f32 %v1304_v7, %v1303_v5 }
 0x149   :  { %v586_v11 = vadd.f32 %v1305_v9, %v501_v52  ;;  %v1306_v14 = vpop.f32.mrb[14].mxu0  ;;  %v802_v9 = vld [vmem:[#allocation5 + $0x590] sm:$0xff] }
 0x14a   :  { %v1307_v15 = vpop.f32.mrb[15].mxu0 }
 0x14b   :  { %v595_v16 = vadd.f32 %v594_v8, %v586_v11  ;;  %v1308_v17 = vadd.f32 %v1307_v15, %v1306_v14  ;;  %v785_v8 = vld [vmem:[#allocation5 + $0x508] sm:$0xff] }
 0x14d   :  { %v591_v18 = vadd.f32 %v1308_v17, %v506_v62 }
 0x14f   :  { %v596_v19 = vadd.f32 %v595_v16, %v591_v18 }
 0x151   :  { %v597_v20 = vrot.slane %v596_v19, 4 }
 0x153   :  { %v598_v23 = vadd.f32 %v597_v20, %v596_v19 }
 0x155   :  { %v599_v24 = vrot.slane %v598_v23, 2 }
 0x157   :  { %v600_v31 = vadd.f32 %v599_v24, %v598_v23 }
 0x159   :  { %v601_v32 = vrot.slane %v600_v31, 1 }
 0x15b   :  { %v602_v0 = vadd.f32 %v601_v32, %v600_v31 }
 0x15d   :  { %v604_v55 = vmul.f32 0.03125, %v602_v0 }
 0x15f   :  { %v605_v10 = vsub.f32 %v576_v21, %v604_v55  ;;  %v606_v34 = vsub.f32 %v581_v4, %v604_v55  ;;  %v607_v36 = vsub.f32 %v586_v11, %v604_v55  ;;  %v608_v38 = vsub.f32 %v591_v18, %v604_v55  ;;  %v803_v11 = vld [vmem:[#allocation5 + $0x598] sm:$0xff] }
 0x160   :  { %v1603_v18 = vpack.c.bf16 %v785_v8, %v784_v2  ;;  %v1605_v19 = vpack.c.bf16 %v803_v11, %v802_v9 }
 0x161   :  { %v609_v41 = vmul.f32 %v605_v10, %v605_v10  ;;  %v610_v42 = vmul.f32 %v606_v34, %v606_v34  ;;  %v611_v35 = vmul.f32 %v607_v36, %v607_v36  ;;  %v612_v28 = vmul.f32 %v608_v38, %v608_v38 }
 0x163   :  { %v613_v43 = vadd.f32 %v610_v42, %v609_v41 }
 0x165   :  { %v614_v44 = vadd.f32 %v613_v43, %v611_v35 }
 0x167   :  { %v615_v45 = vadd.f32 %v614_v44, %v612_v28 }
 0x169   :  { %v616_v37 = vrot.slane %v615_v45, 4 }
 0x16b   :  { %v617_v46 = vadd.f32 %v616_v37, %v615_v45 }
 0x16d   :  { %v618_v47 = vrot.slane %v617_v46, 2 }
 0x16f   :  { %v619_v48 = vadd.f32 %v618_v47, %v617_v46 }
 0x171   :  { %v620_v49 = vrot.slane %v619_v48, 1 }
 0x173   :  { %v621_v50 = vadd.f32 %v620_v49, %v619_v48 }
 0x175   :  { %v622_v40 = vmul.f32 0.03125, %v621_v50  ;;  %v786_v50 = vld [vmem:[#allocation5 + $0x510] sm:$0xff] }
 0x177   :  { %v623_v52 = vadd.f32 1e-05, %v622_v40 }
 0x179   :  { %1638 = vrsqrt.f32 %v623_v52 }
 0x183   :  { %v1639_v54 = vpop.eup %1638 }
 0x184   :  { %v625_v58 = vmul.f32 %v1639_v54, %v605_v10  ;;  %v626_v59 = vmul.f32 %v1639_v54, %v606_v34  ;;  %v627_v61 = vmul.f32 %v1639_v54, %v607_v36  ;;  %v628_v62 = vmul.f32 %v1639_v54, %v608_v38 }
 0x186   :  { %v636_v1 = vmul.f32 %v1163_v56, %v625_v58  ;;  %v637_v29 = vmul.f32 %v1163_v56, %v626_v59  ;;  %v638_v21 = vmul.f32 %v1163_v56, %v627_v61  ;;  %v639_v30 = vmul.f32 %v1163_v56, %v628_v62  ;;  %v804_v56 = vld [vmem:[#allocation5 + $0x5a0] sm:$0xff]  ;;  %v805_v58 = vld [vmem:[#allocation5 + $0x5a8] sm:$0xff] }
 0x188   :  { %v647_v3 = vadd.f32 %v1164_v63, %v636_v1  ;;  %v648_v4 = vadd.f32 %v1164_v63, %v637_v29  ;;  %v649_v5 = vadd.f32 %v1164_v63, %v638_v21  ;;  %v650_v7 = vadd.f32 %v1164_v63, %v639_v30 }
 0x189   :  { %v1607_v21 = vpack.c.bf16 %v787_v53, %v786_v50 }
 0x18a   :  { %v1962_v14 = vmax.f32 %v647_v3, 0.0  ;;  %v1964_v15 = vmax.f32 %v648_v4, 0.0  ;;  %v1966_v16 = vmax.f32 %v649_v5, 0.0  ;;  %v1968_v17 = vmax.f32 %v650_v7, 0.0  ;;  %v788_v5 = vld [vmem:[#allocation5 + $0x520] sm:$0xff]  ;;  %v789_v7 = vld [vmem:[#allocation5 + $0x528] sm:$0xff] }
 0x18b   :  { %v1609_v4 = vpack.c.bf16 %v805_v58, %v804_v56 }
 0x18c   :  { %965 = vmatprep.mubr.f32.mxu0 %v1962_v14  ;;  %v655_v20 = vrot.slane %v1962_v14, 6  ;;  %v658_v23 = vrot.slane %v1968_v17, 6  ;;  %v663_v24 = vrot.slane %v1962_v14, 7  ;;  %v666_v31 = vrot.slane %v1968_v17, 7 }
 0x18d   :  { %v664_v32 = vrot.slane %v1964_v15, 7  ;;  %v671_v0 = vrot.slane %v1962_v14, 1  ;;  %v672_v55 = vrot.slane %v1964_v15, 1  ;;  %v656_v10 = vrot.slane %v1964_v15, 6 }
 0x18e   :  { %v662_v34 = vsel %vm107_vm0, %v658_v23, %v655_v20  ;;  %v670_v36 = vsel %vm116_vm1, %v666_v31, %v663_v24  ;;  %v665_v38 = vrot.slane %v1966_v16, 7  ;;  %v673_v41 = vrot.slane %v1966_v16, 1 }
 0x18f   :  { %1165 = vmatprep.mubr.msk.f32.mxu1 %vm167_vm2, %v662_v34  ;;  %v687_v42 = vsel %vm139_vm3, %v1962_v14, %v670_v36  ;;  %1167 = vmatmul.mubr.msk.f32.vlgmr.msra.gmra.mrb[16].mxu0 %vm187_vm7, %v670_v36  ;;  %v669_v35 = vsel %vm116_vm1, %v663_v24, %v664_v32  ;;  %v1996_v43 = vsel %vm125_vm4, %v671_v0, %v672_v55  ;;  %v657_v28 = vrot.slane %v1966_v16, 6  ;;  %v809_v24 = vld [vmem:[#allocation5 + $0x5c8] sm:$0xff]  ;;  %v794_v34 = vld [vmem:[#allocation5 + $0x550] sm:$0xff]  ;;  %v795_v36 = vld [vmem:[#allocation5 + $0x558] sm:$0xff] }
 0x190   :  { %v695_v44 = vmax.f32 %v687_v42, %v1962_v14  ;;  %970 = vmatprep.mubr.f32.mxu0 %v1964_v15  ;;  %v696_v13 = vmax.f32 %v669_v35, %v1964_v15  ;;  %v661_v6 = vsel %vm107_vm0, %v655_v20, %v656_v10  ;;  %v668_v60 = vsel %vm116_vm1, %v664_v32, %v665_v38  ;;  %v791_v20 = vld [vmem:[#allocation5 + $0x538] sm:$0xff]  ;;  %v792_v32 = vld [vmem:[#allocation5 + $0x540] sm:$0xff] }
 0x191   :  { %v689_v45 = vsel %vm141_vm6, %v1966_v16, %v668_v60  ;;  %v2011_v37 = vsel %vm125_vm4, %v672_v55, %v673_v41  ;;  %v660_v46 = vsel %vm107_vm0, %v656_v10, %v657_v28  ;;  %v667_v47 = vsel %vm116_vm1, %v665_v38, %v666_v31  ;;  %v811_v55 = vld [vmem:[#allocation5 + $0x5d8] sm:$0xff]  ;;  %v812_v38 = vld [vmem:[#allocation5 + $0x5e0] sm:$0xff] }
 0x192   :  { %v699_v48 = vmax.f32 %v695_v44, %v1996_v43  ;;  %v692_v49 = vsel %vm148_vm5, %v1964_v15, %v2011_v37  ;;  %v698_v40 = vmax.f32 %v667_v47, %v1968_v17  ;;  %v674_v52 = vrot.slane %v1968_v17, 1  ;;  %v797_v44 = vld [vmem:[#allocation5 + $0x568] sm:$0xff] }
 0x193   :  { %971 = vmatmul.mubr.f32.gmra.mrb[18].mxu0 %v669_v35  ;;  %v700_v54 = vmax.f32 %v696_v13, %v692_v49  ;;  %v697_v59 = vmax.f32 %v689_v45, %v1966_v16  ;;  %v659_v61 = vsel %vm107_vm0, %v657_v28, %v658_v23  ;;  %v679_v62 = vrot.slane %v1962_v14, 2  ;;  %v806_v14 = vld [vmem:[#allocation5 + $0x5b0] sm:$0xff]  ;;  %v808_v23 = vld [vmem:[#allocation5 + $0x5c0] sm:$0xff] }
 0x194   :  { %881 = vmatmul.mubr.f32.vlgmr.msra.gmra.mrb[8].mxu1 %v699_v48  ;;  %975 = vmatprep.mubr.f32.mxu0 %v1966_v16  ;;  %v2031_v51 = vsel %vm125_vm4, %v673_v41, %v674_v52  ;;  %v2035_v63 = vsel %vm125_vm4, %v674_v52, %v671_v0  ;;  %v680_v1 = vrot.slane %v1964_v15, 2  ;;  %v681_v29 = vrot.slane %v1966_v16, 2  ;;  %v807_v15 = vld [vmem:[#allocation5 + $0x5b8] sm:$0xff]  ;;  %v810_v0 = vld [vmem:[#allocation5 + $0x5d0] sm:$0xff]  ;;  %v813_v41 = vld [vmem:[#allocation5 + $0x5e8] sm:$0xff] }
 0x195   :  { %1604 = vmatpush3.bf16.msra.mxu1 %v1603_v18  ;;  %885 = vmatprep.mubr.f32.mxu1 %v661_v6  ;;  %v701_v30 = vmax.f32 %v697_v59, %v2031_v51  ;;  %v694_v2 = vsel %vm150_vm8, %v1968_v17, %v2035_v63  ;;  %v682_v3 = vrot.slane %v1968_v17, 2  ;;  %v1611_v18 = vpack.c.bf16 %v789_v7, %v788_v5  ;;  %v796_v28 = vld [vmem:[#allocation5 + $0x560] sm:$0xff]  ;;  %v814_v13 = vld [vmem:[#allocation5 + $0x5f0] sm:$0xff]  ;;  %v815_v6 = vld [vmem:[#allocation5 + $0x5f8] sm:$0xff] }
 0x196   :  { %1606 = vmatprep.subr.bf16.mxu1 %v1605_v19  ;;  %v702_v8 = vmax.f32 %v698_v40, %v694_v2  ;;  %v685_v9 = vsel %vm134_vm11, %v679_v62, %v680_v1  ;;  %v684_v11 = vsel %vm134_vm11, %v680_v1, %v681_v29  ;;  %v1613_v19 = vpack.c.bf16 %v807_v15, %v806_v14 }
 0x197   :  { %1168 = vmatmul.mubr.msk.f32.gmra.mrb[20].mxu0 %vm189_vm10, %v668_v60  ;;  %v683_v12 = vsel %vm134_vm11, %v681_v29, %v682_v3  ;;  %v686_v16 = vsel %vm134_vm11, %v682_v3, %v679_v62  ;;  %v1615_v57 = vpack.c.bf16 %v791_v20, %v790_v39  ;;  %v1617_v31 = vpack.c.bf16 %v809_v24, %v808_v23 }
 0x198   :  { %886 = vmatmul.mubr.f32.gmra.mrb[10].mxu1 %v700_v54  ;;  %980 = vmatprep.mubr.f32.mxu0 %v1968_v17  ;;  %v793_v17 = vld [vmem:[#allocation5 + $0x548] sm:$0xff]  ;;  %v1621_v10 = vpack.c.bf16 %v811_v55, %v810_v0  ;;  %v1623_v42 = vpack.c.bf16 %v795_v36, %v794_v34  ;;  %v1625_v35 = vpack.c.bf16 %v813_v41, %v812_v38 }
 0x199   :  { %1608 = vmatpush3.bf16.msra.mxu1 %v1607_v21  ;;  %1166 = vmatprep.mubr.msk.f32.mxu1 %vm169_vm9, %v660_v46  ;;  %v1619_v25 = vpack.c.bf16 %v793_v17, %v792_v32  ;;  %v1627_v60 = vpack.c.bf16 %v797_v44, %v796_v28  ;;  %v1629_v45 = vpack.c.bf16 %v815_v6, %v814_v13  ;;  %v798_v46 = vld [vmem:[#allocation5 + $0x570] sm:$0xff] }
 0x19a   :  { %1610 = vmatprep.subr.bf16.mxu1 %v1609_v4 }
 0x19b   :  { %981 = vmatmul.mubr.f32.gmra.mrb[22].mxu0 %v667_v47  ;;  %v799_v47 = vld [vmem:[#allocation5 + $0x578] sm:$0xff] }
 0x19c   :  { %891 = vmatmul.mubr.f32.gmra.mrb[12].mxu1 %v701_v30  ;;  %v1631_v48 = vpack.c.bf16 %v799_v47, %v798_v46 }
 0x19d   :  { %1612 = vmatpush3.bf16.msra.mxu1 %v1611_v18  ;;  %895 = vmatprep.mubr.f32.mxu1 %v659_v61 }
 0x19e   :  { %1614 = vmatprep.subr.bf16.mxu1 %v1613_v19 }
 0x1a0   :  { %896 = vmatmul.mubr.f32.gmra.mrb[14].mxu1 %v702_v8 }
 0x1a1   :  { %1616 = vmatpush3.bf16.msra.mxu1 %v1615_v57  ;;  %1050 = vmatprep.mubr.f32.mxu1 %v685_v9 }
 0x1a2   :  { %1618 = vmatprep.subr.bf16.mxu1 %v1617_v31 }
 0x1a5   :  { %1620 = vmatpush3.bf16.msra.mxu1 %v1619_v25 }
 0x1a6   :  { %1622 = vmatprep.subr.bf16.mxu1 %v1621_v10 }
 0x1a9   :  { %1624 = vmatpush3.bf16.msra.mxu1 %v1623_v42 }
 0x1aa   :  { %1626 = vmatprep.subr.bf16.mxu1 %v1625_v35 }
 0x1ad   :  { %1628 = vmatpush3.bf16.msra.mxu1 %v1627_v60 }
 0x1ae   :  { %1630 = vmatprep.subr.bf16.mxu1 %v1629_v45 }
 0x1b1   :  { %1632 = vmatpush3.bf16.msra.mxu1 %v1631_v48 }
 0x1b4   :  { %1051 = vmatmul.mubr.f32.vlgmr.msra.gmra.mrb[16].mxu1 %v1996_v43 }
 0x1b5   :  { %1169 = vmatprep.mubr.msk.f32.mxu1 %vm232_vm12, %v684_v11 }
 0x1b8   :  { %1170 = vmatmul.mubr.msk.f32.gmra.mrb[18].mxu1 %vm212_vm13, %v2011_v37 }
 0x1b9   :  { %1060 = vmatprep.mubr.f32.mxu1 %v683_v12 }
 0x1bc   :  { %1061 = vmatmul.mubr.f32.gmra.mrb[20].mxu1 %v2031_v51 }
 0x1bd   :  { %1171 = vmatprep.mubr.msk.f32.mxu1 %vm234_vm14, %v686_v16 }
 0x1c0   :  { %1172 = vmatmul.mubr.msk.f32.gmra.mrb[22].mxu1 %vm214_vm15, %v2035_v63 }
 0x262   :  { %v1385_v49 = vpop.f32.mrb[16].mxu0 }
 0x263   :  { %v1386_v50 = vpop.f32.mrb[17].mxu0 }
 0x264   :  { %v1387_v43 = vadd.f32 %v1386_v50, %v1385_v49 }
 0x266   :  { %v1388_v53 = vpop.f32.mrb[18].mxu0 }
 0x267   :  { %v1341_v26 = vpop.f32.mrb[8].mxu1  ;;  %v1389_v40 = vpop.f32.mrb[19].mxu0 }
 0x268   :  { %v1390_v52 = vadd.f32 %v1389_v40, %v1388_v53  ;;  %v1342_v54 = vpop.f32.mrb[9].mxu1 }
 0x269   :  { %v1343_v27 = vadd.f32 %v1342_v54, %v1341_v26 }
 0x26a   :  { %v1391_v37 = vpop.f32.mrb[20].mxu0 }
 0x26b   :  { %v968_v56 = vadd.f32 %v1387_v43, %v1343_v27  ;;  %v1344_v58 = vpop.f32.mrb[10].mxu1  ;;  %v1392_v59 = vpop.f32.mrb[21].mxu0 }
 0x26c   :  { %v1393_v61 = vadd.f32 %v1392_v59, %v1391_v37  ;;  %v1345_v33 = vpop.f32.mrb[11].mxu1 }
 0x26d   :  { %v1346_v62 = vadd.f32 %v1345_v33, %v1344_v58 }
 0x26e   :  { %v1394_v51 = vpop.f32.mrb[22].mxu0 }
 0x26f   :  { %v973_v1 = vadd.f32 %v1390_v52, %v1346_v62  ;;  %v1347_v22 = vpop.f32.mrb[12].mxu1  ;;  %v1395_v63 = vpop.f32.mrb[23].mxu0  ;;  %v1176_v62 = vld [vmem:[%s2094_s3 + $0x1] ss:$0 sm:$0xff] }
 0x270   :  { %v1396_v29 = vadd.f32 %v1395_v63, %v1394_v51  ;;  %v1348_v21 = vpop.f32.mrb[13].mxu1 }
 0x271   :  { %v1349_v30 = vadd.f32 %v1348_v21, %v1347_v22 }
 0x273   :  { %v978_v2 = vadd.f32 %v1393_v61, %v1349_v30  ;;  %v1350_v3 = vpop.f32.mrb[14].mxu1 }
 0x274   :  { %v1351_v4 = vpop.f32.mrb[15].mxu1 }
 0x275   :  { %v1352_v5 = vadd.f32 %v1351_v4, %v1350_v3 }
 0x277   :  { %v983_v7 = vadd.f32 %v1396_v29, %v1352_v5 }
 0x287   :  { %v1429_v8 = vpop.f32.mrb[16].mxu1 }
 0x288   :  { %v1430_v9 = vpop.f32.mrb[17].mxu1 }
 0x289   :  { %v1431_v11 = vadd.f32 %v1430_v9, %v1429_v8 }
 0x28b   :  { %v1053_v14 = vadd.f32 %v1431_v11, %v968_v56  ;;  %v1432_v15 = vpop.f32.mrb[18].mxu1  ;;  %v1174_v56 = vld [vmem:[%s2093_s2 + $0x1] ss:$0 sm:$0xff]  ;;  %s1686_s2 = scalar_lea.vmem %s1143_s22, 512 }
 0x28c   :  { %v1433_v12 = vpop.f32.mrb[19].mxu1  ;;  %p1687_p2 = scmp.ne.s32.totalorder %s1143_s22, %s1686_s2  ;;  %p1692_p4 = scmp.lt.s32.totalorder %s1686_s2, %s1686_s2 }
 0x28d   :  { %v1434_v16 = vadd.f32 %v1433_v12, %v1432_v15 }
 0x28e   :  { %p1693_p5 = por %p1692_p4, %p1691_p3 }
 0x28f   :  { %v1058_v18 = vadd.f32 %v1434_v16, %v973_v1  ;;  %v1435_v19 = vpop.f32.mrb[20].mxu1 }
 0x290   :  { %v1436_v39 = vpop.f32.mrb[21].mxu1  ;;  %p1694_p6 = pnand %p1693_p5, %p1687_p2 }
 0x291   :  { %v1071_v20 = vadd.f32 %v1058_v18, %v1053_v14  ;;  %v1437_v23 = vadd.f32 %v1436_v39, %v1435_v19 }
 0x293   :  { %v1063_v24 = vadd.f32 %v1437_v23, %v978_v2  ;;  %v1438_v57 = vpop.f32.mrb[22].mxu1 }
 0x294   :  { %v1439_v31 = vpop.f32.mrb[23].mxu1 }
 0x295   :  { %v1072_v32 = vadd.f32 %v1071_v20, %v1063_v24  ;;  %v1440_v17 = vadd.f32 %v1439_v31, %v1438_v57 }
 0x297   :  { %v1068_v0 = vadd.f32 %v1440_v17, %v983_v7 }
 0x299   :  { %v1073_v55 = vadd.f32 %v1072_v32, %v1068_v0 }
 0x29b   :  { %v1074_v25 = vrot.slane %v1073_v55, 4 }
 0x29d   :  { %v1075_v10 = vadd.f32 %v1074_v25, %v1073_v55 }
 0x29f   :  { %v1076_v34 = vrot.slane %v1075_v10, 2 }
 0x2a1   :  { %v1077_v36 = vadd.f32 %v1076_v34, %v1075_v10 }
 0x2a3   :  { %v1078_v38 = vrot.slane %v1077_v36, 1 }
 0x2a5   :  { %v1079_v41 = vadd.f32 %v1078_v38, %v1077_v36 }
 0x2a7   :  { %v1080_v42 = vmul.f32 0.03125, %v1079_v41 }
 0x2a9   :  { %v1081_v35 = vsub.f32 %v1053_v14, %v1080_v42  ;;  %v1082_v28 = vsub.f32 %v1058_v18, %v1080_v42  ;;  %v1083_v44 = vsub.f32 %v1063_v24, %v1080_v42  ;;  %v1084_v13 = vsub.f32 %v1068_v0, %v1080_v42 }
 0x2ab   :  { %v1085_v6 = vmul.f32 %v1081_v35, %v1081_v35  ;;  %v1086_v60 = vmul.f32 %v1082_v28, %v1082_v28  ;;  %v1087_v45 = vmul.f32 %v1083_v44, %v1083_v44  ;;  %v1088_v47 = vmul.f32 %v1084_v13, %v1084_v13 }
 0x2ad   :  { %v1089_v46 = vadd.f32 %v1086_v60, %v1085_v6 }
 0x2af   :  { %v1090_v48 = vadd.f32 %v1089_v46, %v1087_v45 }
 0x2b1   :  { %v1091_v49 = vadd.f32 %v1090_v48, %v1088_v47 }
 0x2b3   :  { %v1092_v50 = vrot.slane %v1091_v49, 4 }
 0x2b5   :  { %v1093_v43 = vadd.f32 %v1092_v50, %v1091_v49 }
 0x2b7   :  { %v1094_v53 = vrot.slane %v1093_v43, 2 }
 0x2b9   :  { %v1095_v26 = vadd.f32 %v1094_v53, %v1093_v43 }
 0x2bb   :  { %v1096_v40 = vrot.slane %v1095_v26, 1 }
 0x2bd   :  { %v1097_v52 = vadd.f32 %v1096_v40, %v1095_v26 }
 0x2bf   :  { %v1098_v54 = vmul.f32 0.03125, %v1097_v52 }
 0x2c1   :  { %v1099_v27 = vadd.f32 1e-05, %v1098_v54 }
 0x2c3   :  { %1640 = vrsqrt.f32 %v1099_v27 }
 0x2cd   :  { %v1641_v37 = vpop.eup %1640 }
 0x2ce   :  { %v1104_v58 = vmul.f32 %v1641_v37, %v1084_v13  ;;  %v1101_v59 = vmul.f32 %v1641_v37, %v1081_v35  ;;  %v1102_v61 = vmul.f32 %v1641_v37, %v1082_v28  ;;  %v1103_v33 = vmul.f32 %v1641_v37, %v1083_v44 }
 0x2d0   :  { %v1116_v51 = vmul.f32 %v1174_v56, %v1104_v58  ;;  %v1113_v1 = vmul.f32 %v1174_v56, %v1101_v59  ;;  %v1114_v22 = vmul.f32 %v1174_v56, %v1102_v61  ;;  %v1115_v63 = vmul.f32 %v1174_v56, %v1103_v33 }
 0x2d2   :  { %v1128_v29 = vadd.f32 %v1176_v62, %v1116_v51  ;;  %v1125_v21 = vadd.f32 %v1176_v62, %v1113_v1  ;;  %v1126_v30 = vadd.f32 %v1176_v62, %v1114_v22  ;;  %v1127_v2 = vadd.f32 %v1176_v62, %v1115_v63 }
 0x2d4   :  { %v1129_v3 = vmax.f32 %v1125_v21, 0.0  ;;  %v1130_v4 = vmax.f32 %v1126_v30, 0.0  ;;  %v1131_v5 = vmax.f32 %v1127_v2, 0.0  ;;  %v1132_v7 = vmax.f32 %v1128_v29, 0.0 }
 0x2d6   :  { %1133 = vst [vmem:[#allocation7] sm:$0xff] %v1129_v3  ;;  %1134 = vst [vmem:[#allocation7 + $0x8] sm:$0xff] %v1130_v4 }
 0x2d7   :  { %1135 = vst [vmem:[#allocation7 + $0x10] sm:$0xff] %v1131_v5  ;;  %1136 = vst [vmem:[#allocation7 + $0x18] sm:$0xff] %v1132_v7 }
 0x2d8   :  { %1697 = shalt.err (!%p1694_p6)
}
 0x2d9   :  { %s1698_s24 = scalar_lea.hbm %s2095_s4, 512 }
 0x2da   :  { %p1699_p7 = scmp.ne.s32.totalorder %s2095_s4, %s1698_s24  ;;  %p1702_p8 = scmp.lt.u32.totalorder %s1698_s24, %s2095_s4 }
 0x2dc   :  { %p1704_p9 = pnand %p1702_p8, %p1699_p7 }
 0x2de   :  { %1707 = shalt.err (!%p1704_p9)
}
 0x2df   :  { %1148 = dma.vmem_to_hbm [thread:$0]  %s1143_s22, 512, %s2095_s4, [#allocation4], %s1715_s25, %s1715_s25, %s1716_s26  }
 0x2e0   :  { %1712 = dma.done.wait [#allocation4], 512  }
 0x2e1   :  { %1713 = vsyncadd [#allocation4], 4294966784 }
 0x2e2   :  { %1152 = vsyncpa [#allocation3], 1 }
 0x2e3   :  { %1153 = vsyncpa [#allocation6], 1 }
 0x2e4   :  { %1154 = vsyncpa [#allocation4], 1 }

</bundles_post_ra>
